<compile_context>
chip_gen: v6e
topology: v6e:2x2x1
jax: 0.10.0
libtpu: 0.0.40
codegen_flags: <defaults>
</compile_context>

<pallas_src>
import jax
import jax.numpy as jnp
from jax import lax
from jax.experimental import pallas as pl
from jax.experimental.pallas import tpu as pltpu

EPS = 1e-5
GROUPS = 4

# Row indices inside the packed per-lane parameter array `vecs`.
# rows 0..8 : depthwise-3x3 taps, row = 3*di + dj, tiled over W -> L lanes
_R_DW3B = 9
_R_GN1W, _R_GN1B = 10, 11
_R_DW1W, _R_DW1B = 12, 13
_R_GN2W, _R_GN2B = 14, 15
_R_RDWW, _R_RDWB = 16, 17
_R_GN3W, _R_GN3B = 18, 19
_R_PW1B = 20          # bias for [pw1 | attention-logit] matmul (width 2L)
_R_OUTB = 21          # bias for fused (pw2 + residual-pw) matmul (width W*Cout)
_N_ROWS = 22


def _dga_kernel(xpad_ref, vecs_ref, pw1_ref, pwf_ref, gmap_ref, o_ref):
    L = pw1_ref.shape[0]                      # W * C lanes
    C = (xpad_ref.shape[2] - L) // 2          # xpad lanes = (W + 2) * C
    H = o_ref.shape[1]
    LO = o_ref.shape[2]                       # W * Cout lanes

    def vec(row, width=L):                    # (1, width) per-lane parameter row
        return vecs_ref[row:row + 1, :width]

    gmap = gmap_ref[...]                      # (L, L) group-average matrix

    def gnorm(y, r_w, r_b):
        # Two-pass GroupNorm: group mean, then E[(x - mu)^2] (no cancellation).
        s = jnp.sum(y, axis=0, keepdims=True)                          # (1, L)
        mu = jnp.dot(s, gmap, preferred_element_type=jnp.float32)      # (1, L)
        d = y - mu
        var = jnp.dot(jnp.sum(d * d, axis=0, keepdims=True), gmap,
                      preferred_element_type=jnp.float32)
        return d * lax.rsqrt(var + EPS) * vec(r_w) + vec(r_b)

    xpad = xpad_ref[0]                        # (H + 2, (W + 2) * C), zero halo
    # Three lane-shifted slabs (one per horizontal tap offset); the vertical
    # tap offsets are cheap sublane slices of these.
    xs = [xpad[:, dj * C:dj * C + L] for dj in range(3)]
    xin = xs[1][1:H + 1, :]                   # un-padded input interior (H, L)

    # ---- depthwise 3x3 conv (center tap initializes the accumulator) ----
    acc = xin * vec(4)
    for di in range(3):
        for dj in range(3):
            if di == 1 and dj == 1:
                continue
            acc = acc + xs[dj][di:di + H, :] * vec(3 * di + dj)
    acc = acc + vec(_R_DW3B)
    acc = gnorm(acc, _R_GN1W, _R_GN1B)

    # ---- pointwise 1x1 + fused spatial-attention logits ----
    # pw1_ref = [kron(I_W, pw1_w) | kron(I_W, (pw1_w @ sa_w) broadcast over C)]
    # so lanes [L:2L) hold the attention logit repeated per channel of a pixel.
    out1 = jnp.dot(acc, pw1_ref[...], preferred_element_type=jnp.float32) \
        + vec(_R_PW1B, 2 * L)                                          # (H, 2L)
    out1 = out1[:, :L] * jax.nn.sigmoid(out1[:, L:])

    # ---- output_conv (dw 1x1 + GN) and residual_conv (dw 1x1 + GN) ----
    h2 = gnorm(out1 * vec(_R_DW1W) + vec(_R_DW1B), _R_GN2W, _R_GN2B)
    rs = gnorm(xin * vec(_R_RDWW) + vec(_R_RDWB), _R_GN3W, _R_GN3B)

    # ---- fused pointwise (pw2 ++ residual-pw): one matmul -> out + residual --
    cat = jnp.concatenate([h2, rs], axis=-1)                           # (H, 2L)
    o_ref[0] = jnp.dot(cat, pwf_ref[...], preferred_element_type=jnp.float32) \
        + vec(_R_OUTB, LO)


# ---------------- host-side parameter packing ----------------
def _pack_params(p, H, W, C, Cout):
    L, LO = W * C, W * Cout
    cg = C // GROUPS
    eye_w = jnp.eye(W, dtype=jnp.float32)

    def tile_l(v):                            # (C,) -> (L,) per-lane
        return jnp.tile(v, W)

    sa = p["sa_w"][0]                         # (C,)
    pw1_sa = p["pw1_w"] @ sa                  # (C,)

    # [pw1 | attention-logit] block-diagonal weight, (L, 2L).
    att_block = pw1_sa[:, None] * jnp.ones((1, C), jnp.float32)        # (C, C)
    pw1_ext = jnp.concatenate(
        [jnp.kron(eye_w, p["pw1_w"]), jnp.kron(eye_w, att_block)], axis=1)
    pw1b_ext = jnp.concatenate(
        [tile_l(p["pw1_b"][0]),
         jnp.full((L,), jnp.dot(p["pw1_b"][0], sa), jnp.float32)])     # (2L,)

    # Fused (pw2 ++ residual-pw) block-diagonal weight, (2L, LO).
    pwf = jnp.concatenate(
        [jnp.kron(eye_w, p["pw2_w"]), jnp.kron(eye_w, p["rpw_w"])], axis=0)
    outb = jnp.tile(p["pw2_b"][0], W) + jnp.tile(p["rpw_b"][0], W)     # (LO,)

    # Per-lane group-averaging matrix (carries the 1/(H*W*Cg) factor).
    grp = (jnp.arange(L) % C) // cg
    gmap = (grp[:, None] == grp[None, :]).astype(jnp.float32) / (H * W * cg)

    width = max(L, 2 * L, LO)

    def row(v):
        return jnp.pad(v, (0, width - v.shape[0]))[None, :]

    rows = [row(tile_l(p["dw3_w"][di, dj]))
            for di in range(3) for dj in range(3)]                     # 9 taps
    rows += [row(tile_l(p[k][0])) for k in
             ("dw3_b", "gn1_w", "gn1_b", "dw1_w", "dw1_b",
              "gn2_w", "gn2_b", "rdw_w", "rdw_b", "gn3_w", "gn3_b")]
    rows += [row(pw1b_ext), row(outb)]
    vecs = jnp.concatenate(rows, axis=0)      # (_N_ROWS, width)
    assert vecs.shape[0] == _N_ROWS
    return vecs, pw1_ext, pwf, gmap


def _const_spec(a):
    nd = a.ndim
    return pl.BlockSpec(a.shape, lambda n, _nd=nd: (0,) * _nd)


@jax.jit
def lightweight_dga(x, params):
    """x: (N, H, W, Cin) float32 -> (N, H, W, Cout) float32."""
    N, H, W, C = x.shape
    Cout = params["pw2_w"].shape[1]
    LO = W * Cout

    # Single padded input, presented lane-dense as (N, H+2, (W+2)*C); the
    # reshape only collapses trailing contiguous dims (no data movement).
    xpad = jnp.pad(x, ((0, 0), (1, 1), (1, 1), (0, 0)))
    xpad = xpad.reshape(N, H + 2, (W + 2) * C)
    vecs, pw1_ext, pwf, gmap = _pack_params(params, H, W, C, Cout)

    # TODO(synk): for much larger H*W*C add an H-tile grid axis (2-row halo via
    # an overlapping index_map) and set vmem_limit_bytes explicitly so the
    # per-step blocks also fit v7x's smaller (64 MiB) VMEM.
    out = pl.pallas_call(
        _dga_kernel,
        out_shape=jax.ShapeDtypeStruct((N, H, LO), jnp.float32),
        grid=(N,),
        in_specs=[
            pl.BlockSpec((1, H + 2, (W + 2) * C), lambda n: (n, 0, 0)),
            _const_spec(vecs),
            _const_spec(pw1_ext),
            _const_spec(pwf),
            _const_spec(gmap),
        ],
        out_specs=pl.BlockSpec((1, H, LO), lambda n: (n, 0, 0)),
        compiler_params=pltpu.CompilerParams(
            dimension_semantics=("parallel",)),  # batch axis feeds v7x's 2 TCs
    )(xpad, vecs, pw1_ext, pwf, gmap)
    return out.reshape(N, H, W, Cout)


# ---------------- deterministic parameter init ----------------
def init_params(key, cin, cout):
    ks = jax.random.split(key, 19)

    def nrm(k, shape, s=0.2):
        return s * jax.random.normal(k, shape, jnp.float32)

    p = {}
    p["dw3_w"] = nrm(ks[0], (3, 3, cin))
    p["dw3_b"] = nrm(ks[1], (1, cin), 0.1)
    p["gn1_w"] = 1.0 + nrm(ks[2], (1, cin), 0.1)
    p["gn1_b"] = nrm(ks[3], (1, cin), 0.1)
    p["pw1_w"] = nrm(ks[4], (cin, cin))
    p["pw1_b"] = nrm(ks[5], (1, cin), 0.1)
    p["sa_w"] = nrm(ks[6], (1, cin))
    p["dw1_w"] = 1.0 + nrm(ks[7], (1, cin))
    p["dw1_b"] = nrm(ks[8], (1, cin), 0.1)
    p["gn2_w"] = 1.0 + nrm(ks[9], (1, cin), 0.1)
    p["gn2_b"] = nrm(ks[10], (1, cin), 0.1)
    p["pw2_w"] = nrm(ks[11], (cin, cout))
    p["pw2_b"] = nrm(ks[12], (1, cout), 0.1)
    p["rdw_w"] = 1.0 + nrm(ks[13], (1, cin))
    p["rdw_b"] = nrm(ks[14], (1, cin), 0.1)
    p["gn3_w"] = 1.0 + nrm(ks[15], (1, cin), 0.1)
    p["gn3_b"] = nrm(ks[16], (1, cin), 0.1)
    p["rpw_w"] = nrm(ks[17], (cin, cout))
    p["rpw_b"] = nrm(ks[18], (1, cout), 0.1)
    return p


# ---------------- pure-JAX reference (mirrors PyTorch semantics) ----------------
def _ref_group_norm(y, gamma, beta):
    N, H, W, C = y.shape
    cg = C // GROUPS
    yg = y.reshape(N, H, W, GROUPS, cg)
    mu = yg.mean(axis=(1, 2, 4), keepdims=True)
    var = ((yg - mu) ** 2).mean(axis=(1, 2, 4), keepdims=True)
    yn = ((yg - mu) / jnp.sqrt(var + EPS)).reshape(N, H, W, C)
    return yn * gamma + beta


def ref_forward(x, p):
    def dwsep(h, dww, dwb, gnw, gnb, pww, pwb, k):
        if k == 3:
            rhs = dww[:, :, None, :]  # (3,3,1,C) HWIO, groups=C
            h = lax.conv_general_dilated(
                h, rhs, (1, 1), "SAME",
                dimension_numbers=("NHWC", "HWIO", "NHWC"),
                feature_group_count=h.shape[-1]) + dwb
        else:
            h = h * dww + dwb
        h = _ref_group_norm(h, gnw, gnb)
        return jnp.einsum("nhwc,cd->nhwd", h, pww) + pwb

    out = dwsep(x, p["dw3_w"], p["dw3_b"][0], p["gn1_w"][0], p["gn1_b"][0],
                p["pw1_w"], p["pw1_b"][0], 3)
    att = jax.nn.sigmoid(jnp.einsum("nhwc,c->nhw", out, p["sa_w"][0])[..., None])
    out = out * att
    out = dwsep(out, p["dw1_w"][0], p["dw1_b"][0], p["gn2_w"][0], p["gn2_b"][0],
                p["pw2_w"], p["pw2_b"][0], 1)
    res = dwsep(x, p["rdw_w"][0], p["rdw_b"][0], p["gn3_w"][0], p["gn3_b"][0],
                p["rpw_w"], p["rpw_b"][0], 1)
    return out + res


if __name__ == "__main__":
    N, H, W, CIN, COUT = 2, 16, 16, 8, 16
    key = jax.random.PRNGKey(0)
    kx, kp = jax.random.split(key)
    x = jax.random.normal(kx, (N, H, W, CIN), jnp.float32)
    params = init_params(kp, CIN, COUT)

    y = lightweight_dga(x, params)
    y = jax.block_until_ready(y)
    assert y.shape == (N, H, W, COUT)

    y_ref = ref_forward(x, params)
    err = float(jnp.max(jnp.abs(y - y_ref)))
    assert err < 5e-3, f"max abs error {err}"
    print("KERNEL_OK")
</pallas_src>

<mosaic_0001>
module attributes {stable_mosaic.version = 11 : i64} {
  func.func @_dga_kernel(%arg0: i32, %arg1: memref<1x18x144xf32, #tpu.memory_space<vmem>>, %arg2: memref<22x256xf32, #tpu.memory_space<vmem>>, %arg3: memref<128x256xf32, #tpu.memory_space<vmem>>, %arg4: memref<256x256xf32, #tpu.memory_space<vmem>>, %arg5: memref<128x128xf32, #tpu.memory_space<vmem>>, %arg6: memref<1x16x256xf32, #tpu.memory_space<vmem>>) attributes {dimension_semantics = [#tpu.dimension_semantics<parallel>], iteration_bounds = array<i64: 2>, scalar_prefetch = 0 : i64, scratch_operands = 0 : i64, tpu.core_type = #tpu.core_type<tc>, window_params = [{transform_indices = @transform_0, window_bounds = array<i64: 1, 18, 144>}, {pipeline_mode = #tpu.pipeline_mode<synchronous>, transform_indices = @transform_1, window_bounds = array<i64: 22, 256>}, {pipeline_mode = #tpu.pipeline_mode<synchronous>, transform_indices = @transform_2, window_bounds = array<i64: 128, 256>}, {pipeline_mode = #tpu.pipeline_mode<synchronous>, transform_indices = @transform_3, window_bounds = array<i64: 256, 256>}, {pipeline_mode = #tpu.pipeline_mode<synchronous>, transform_indices = @transform_4, window_bounds = array<i64: 128, 128>}, {transform_indices = @transform_5, window_bounds = array<i64: 1, 16, 256>}]} {
    %c0 = arith.constant 0 : index
    %c0_0 = arith.constant 0 : index
    %0 = vector.load %arg5[%c0, %c0_0] : memref<128x128xf32, #tpu.memory_space<vmem>>, vector<128x128xf32>
    %c0_1 = arith.constant 0 : index
    %c0_2 = arith.constant 0 : index
    %c0_3 = arith.constant 0 : index
    %1 = vector.load %arg1[%c0_1, %c0_2, %c0_3] : memref<1x18x144xf32, #tpu.memory_space<vmem>>, vector<1x18x144xf32>
    %2 = vector.shape_cast %1 : vector<1x18x144xf32> to vector<18x144xf32>
    %3 = vector.extract_strided_slice %2 {offsets = [0, 0], sizes = [18, 128], strides = [1, 1]} : vector<18x144xf32> to vector<18x128xf32>
    %4 = vector.extract_strided_slice %2 {offsets = [0, 8], sizes = [18, 128], strides = [1, 1]} : vector<18x144xf32> to vector<18x128xf32>
    %5 = vector.extract_strided_slice %2 {offsets = [0, 16], sizes = [18, 128], strides = [1, 1]} : vector<18x144xf32> to vector<18x128xf32>
    %6 = vector.extract_strided_slice %4 {offsets = [1, 0], sizes = [16, 128], strides = [1, 1]} : vector<18x128xf32> to vector<16x128xf32>
    %c4 = arith.constant 4 : index
    %c0_4 = arith.constant 0 : index
    %7 = vector.load %arg2[%c4, %c0_4] : memref<22x256xf32, #tpu.memory_space<vmem>>, vector<1x128xf32>
    %8 = vector.broadcast %7 : vector<1x128xf32> to vector<16x128xf32>
    %9 = arith.mulf %6, %8 : vector<16x128xf32>
    %10 = vector.extract_strided_slice %3 {offsets = [0, 0], sizes = [16, 128], strides = [1, 1]} : vector<18x128xf32> to vector<16x128xf32>
    %c0_5 = arith.constant 0 : index
    %c0_6 = arith.constant 0 : index
    %11 = vector.load %arg2[%c0_5, %c0_6] : memref<22x256xf32, #tpu.memory_space<vmem>>, vector<1x128xf32>
    %12 = vector.broadcast %11 : vector<1x128xf32> to vector<16x128xf32>
    %13 = arith.mulf %10, %12 : vector<16x128xf32>
    %14 = arith.addf %9, %13 : vector<16x128xf32>
    %15 = vector.extract_strided_slice %4 {offsets = [0, 0], sizes = [16, 128], strides = [1, 1]} : vector<18x128xf32> to vector<16x128xf32>
    %c1 = arith.constant 1 : index
    %c0_7 = arith.constant 0 : index
    %16 = vector.load %arg2[%c1, %c0_7] : memref<22x256xf32, #tpu.memory_space<vmem>>, vector<1x128xf32>
    %17 = vector.broadcast %16 : vector<1x128xf32> to vector<16x128xf32>
    %18 = arith.mulf %15, %17 : vector<16x128xf32>
    %19 = arith.addf %14, %18 : vector<16x128xf32>
    %20 = vector.extract_strided_slice %5 {offsets = [0, 0], sizes = [16, 128], strides = [1, 1]} : vector<18x128xf32> to vector<16x128xf32>
    %c2 = arith.constant 2 : index
    %c0_8 = arith.constant 0 : index
    %21 = vector.load %arg2[%c2, %c0_8] : memref<22x256xf32, #tpu.memory_space<vmem>>, vector<1x128xf32>
    %22 = vector.broadcast %21 : vector<1x128xf32> to vector<16x128xf32>
    %23 = arith.mulf %20, %22 : vector<16x128xf32>
    %24 = arith.addf %19, %23 : vector<16x128xf32>
    %25 = vector.extract_strided_slice %3 {offsets = [1, 0], sizes = [16, 128], strides = [1, 1]} : vector<18x128xf32> to vector<16x128xf32>
    %c3 = arith.constant 3 : index
    %c0_9 = arith.constant 0 : index
    %26 = vector.load %arg2[%c3, %c0_9] : memref<22x256xf32, #tpu.memory_space<vmem>>, vector<1x128xf32>
    %27 = vector.broadcast %26 : vector<1x128xf32> to vector<16x128xf32>
    %28 = arith.mulf %25, %27 : vector<16x128xf32>
    %29 = arith.addf %24, %28 : vector<16x128xf32>
    %30 = vector.extract_strided_slice %5 {offsets = [1, 0], sizes = [16, 128], strides = [1, 1]} : vector<18x128xf32> to vector<16x128xf32>
    %c5 = arith.constant 5 : index
    %c0_10 = arith.constant 0 : index
    %31 = vector.load %arg2[%c5, %c0_10] : memref<22x256xf32, #tpu.memory_space<vmem>>, vector<1x128xf32>
    %32 = vector.broadcast %31 : vector<1x128xf32> to vector<16x128xf32>
    %33 = arith.mulf %30, %32 : vector<16x128xf32>
    %34 = arith.addf %29, %33 : vector<16x128xf32>
    %35 = vector.extract_strided_slice %3 {offsets = [2, 0], sizes = [16, 128], strides = [1, 1]} : vector<18x128xf32> to vector<16x128xf32>
    %c6 = arith.constant 6 : index
    %c0_11 = arith.constant 0 : index
    %36 = vector.load %arg2[%c6, %c0_11] : memref<22x256xf32, #tpu.memory_space<vmem>>, vector<1x128xf32>
    %37 = vector.broadcast %36 : vector<1x128xf32> to vector<16x128xf32>
    %38 = arith.mulf %35, %37 : vector<16x128xf32>
    %39 = arith.addf %34, %38 : vector<16x128xf32>
    %40 = vector.extract_strided_slice %4 {offsets = [2, 0], sizes = [16, 128], strides = [1, 1]} : vector<18x128xf32> to vector<16x128xf32>
    %c7 = arith.constant 7 : index
    %c0_12 = arith.constant 0 : index
    %41 = vector.load %arg2[%c7, %c0_12] : memref<22x256xf32, #tpu.memory_space<vmem>>, vector<1x128xf32>
    %42 = vector.broadcast %41 : vector<1x128xf32> to vector<16x128xf32>
    %43 = arith.mulf %40, %42 : vector<16x128xf32>
    %44 = arith.addf %39, %43 : vector<16x128xf32>
    %45 = vector.extract_strided_slice %5 {offsets = [2, 0], sizes = [16, 128], strides = [1, 1]} : vector<18x128xf32> to vector<16x128xf32>
    %c8 = arith.constant 8 : index
    %c0_13 = arith.constant 0 : index
    %46 = vector.load %arg2[%c8, %c0_13] : memref<22x256xf32, #tpu.memory_space<vmem>>, vector<1x128xf32>
    %47 = vector.broadcast %46 : vector<1x128xf32> to vector<16x128xf32>
    %48 = arith.mulf %45, %47 : vector<16x128xf32>
    %49 = arith.addf %44, %48 : vector<16x128xf32>
    %c9 = arith.constant 9 : index
    %c0_14 = arith.constant 0 : index
    %50 = vector.load %arg2[%c9, %c0_14] : memref<22x256xf32, #tpu.memory_space<vmem>>, vector<1x128xf32>
    %51 = vector.broadcast %50 : vector<1x128xf32> to vector<16x128xf32>
    %52 = arith.addf %49, %51 : vector<16x128xf32>
    %cst = arith.constant dense<0.000000e+00> : vector<128xf32>
    %53 = vector.multi_reduction <add>, %52, %cst [0] : vector<16x128xf32> to vector<128xf32>
    %54 = vector.shape_cast %53 : vector<128xf32> to vector<1x128xf32>
    %cst_15 = arith.constant dense<0.000000e+00> : vector<1x128xf32>
    %55 = tpu.matmul %54, %0, %cst_15 {dimension_numbers = #tpu.dot_dimension_numbers<[1], [0], [0], [1], [0, 0, 1, 1], [], []>} : vector<1x128xf32>, vector<128x128xf32>, vector<1x128xf32> -> vector<1x128xf32>
    %56 = vector.broadcast %55 : vector<1x128xf32> to vector<16x128xf32>
    %57 = arith.subf %52, %56 : vector<16x128xf32>
    %58 = arith.mulf %57, %57 : vector<16x128xf32>
    %cst_16 = arith.constant dense<0.000000e+00> : vector<128xf32>
    %59 = vector.multi_reduction <add>, %58, %cst_16 [0] : vector<16x128xf32> to vector<128xf32>
    %60 = vector.shape_cast %59 : vector<128xf32> to vector<1x128xf32>
    %cst_17 = arith.constant dense<0.000000e+00> : vector<1x128xf32>
    %61 = tpu.matmul %60, %0, %cst_17 {dimension_numbers = #tpu.dot_dimension_numbers<[1], [0], [0], [1], [0, 0, 1, 1], [], []>} : vector<1x128xf32>, vector<128x128xf32>, vector<1x128xf32> -> vector<1x128xf32>
    %cst_18 = arith.constant 9.99999974E-6 : f32
    %62 = vector.broadcast %cst_18 : f32 to vector<1x128xf32>
    %63 = arith.addf %61, %62 : vector<1x128xf32>
    %64 = math.rsqrt %63 : vector<1x128xf32>
    %65 = vector.broadcast %64 : vector<1x128xf32> to vector<16x128xf32>
    %66 = arith.mulf %57, %65 : vector<16x128xf32>
    %c10 = arith.constant 10 : index
    %c0_19 = arith.constant 0 : index
    %67 = vector.load %arg2[%c10, %c0_19] : memref<22x256xf32, #tpu.memory_space<vmem>>, vector<1x128xf32>
    %68 = vector.broadcast %67 : vector<1x128xf32> to vector<16x128xf32>
    %69 = arith.mulf %66, %68 : vector<16x128xf32>
    %c11 = arith.constant 11 : index
    %c0_20 = arith.constant 0 : index
    %70 = vector.load %arg2[%c11, %c0_20] : memref<22x256xf32, #tpu.memory_space<vmem>>, vector<1x128xf32>
    %71 = vector.broadcast %70 : vector<1x128xf32> to vector<16x128xf32>
    %72 = arith.addf %69, %71 : vector<16x128xf32>
    %c0_21 = arith.constant 0 : index
    %c0_22 = arith.constant 0 : index
    %73 = vector.load %arg3[%c0_21, %c0_22] : memref<128x256xf32, #tpu.memory_space<vmem>>, vector<128x256xf32>
    %cst_23 = arith.constant dense<0.000000e+00> : vector<16x256xf32>
    %74 = tpu.matmul %72, %73, %cst_23 {dimension_numbers = #tpu.dot_dimension_numbers<[1], [0], [0], [1], [0, 0, 1, 1], [], []>} : vector<16x128xf32>, vector<128x256xf32>, vector<16x256xf32> -> vector<16x256xf32>
    %c20 = arith.constant 20 : index
    %c0_24 = arith.constant 0 : index
    %75 = vector.load %arg2[%c20, %c0_24] : memref<22x256xf32, #tpu.memory_space<vmem>>, vector<1x256xf32>
    %76 = vector.broadcast %75 : vector<1x256xf32> to vector<16x256xf32>
    %77 = arith.addf %74, %76 : vector<16x256xf32>
    %78 = vector.extract_strided_slice %77 {offsets = [0, 0], sizes = [16, 128], strides = [1, 1]} : vector<16x256xf32> to vector<16x128xf32>
    %79 = vector.extract_strided_slice %77 {offsets = [0, 128], sizes = [16, 128], strides = [1, 1]} : vector<16x256xf32> to vector<16x128xf32>
    %80 = arith.negf %79 : vector<16x128xf32>
    %81 = math.exp %80 : vector<16x128xf32>
    %cst_25 = arith.constant 1.000000e+00 : f32
    %82 = vector.broadcast %cst_25 : f32 to vector<16x128xf32>
    %83 = arith.addf %82, %81 : vector<16x128xf32>
    %84 = arith.divf %82, %83 : vector<16x128xf32>
    %85 = arith.mulf %78, %84 : vector<16x128xf32>
    %c12 = arith.constant 12 : index
    %c0_26 = arith.constant 0 : index
    %86 = vector.load %arg2[%c12, %c0_26] : memref<22x256xf32, #tpu.memory_space<vmem>>, vector<1x128xf32>
    %87 = vector.broadcast %86 : vector<1x128xf32> to vector<16x128xf32>
    %88 = arith.mulf %85, %87 : vector<16x128xf32>
    %c13 = arith.constant 13 : index
    %c0_27 = arith.constant 0 : index
    %89 = vector.load %arg2[%c13, %c0_27] : memref<22x256xf32, #tpu.memory_space<vmem>>, vector<1x128xf32>
    %90 = vector.broadcast %89 : vector<1x128xf32> to vector<16x128xf32>
    %91 = arith.addf %88, %90 : vector<16x128xf32>
    %cst_28 = arith.constant dense<0.000000e+00> : vector<128xf32>
    %92 = vector.multi_reduction <add>, %91, %cst_28 [0] : vector<16x128xf32> to vector<128xf32>
    %93 = vector.shape_cast %92 : vector<128xf32> to vector<1x128xf32>
    %cst_29 = arith.constant dense<0.000000e+00> : vector<1x128xf32>
    %94 = tpu.matmul %93, %0, %cst_29 {dimension_numbers = #tpu.dot_dimension_numbers<[1], [0], [0], [1], [0, 0, 1, 1], [], []>} : vector<1x128xf32>, vector<128x128xf32>, vector<1x128xf32> -> vector<1x128xf32>
    %95 = vector.broadcast %94 : vector<1x128xf32> to vector<16x128xf32>
    %96 = arith.subf %91, %95 : vector<16x128xf32>
    %97 = arith.mulf %96, %96 : vector<16x128xf32>
    %cst_30 = arith.constant dense<0.000000e+00> : vector<128xf32>
    %98 = vector.multi_reduction <add>, %97, %cst_30 [0] : vector<16x128xf32> to vector<128xf32>
    %99 = vector.shape_cast %98 : vector<128xf32> to vector<1x128xf32>
    %cst_31 = arith.constant dense<0.000000e+00> : vector<1x128xf32>
    %100 = tpu.matmul %99, %0, %cst_31 {dimension_numbers = #tpu.dot_dimension_numbers<[1], [0], [0], [1], [0, 0, 1, 1], [], []>} : vector<1x128xf32>, vector<128x128xf32>, vector<1x128xf32> -> vector<1x128xf32>
    %cst_32 = arith.constant 9.99999974E-6 : f32
    %101 = vector.broadcast %cst_32 : f32 to vector<1x128xf32>
    %102 = arith.addf %100, %101 : vector<1x128xf32>
    %103 = math.rsqrt %102 : vector<1x128xf32>
    %104 = vector.broadcast %103 : vector<1x128xf32> to vector<16x128xf32>
    %105 = arith.mulf %96, %104 : vector<16x128xf32>
    %c14 = arith.constant 14 : index
    %c0_33 = arith.constant 0 : index
    %106 = vector.load %arg2[%c14, %c0_33] : memref<22x256xf32, #tpu.memory_space<vmem>>, vector<1x128xf32>
    %107 = vector.broadcast %106 : vector<1x128xf32> to vector<16x128xf32>
    %108 = arith.mulf %105, %107 : vector<16x128xf32>
    %c15 = arith.constant 15 : index
    %c0_34 = arith.constant 0 : index
    %109 = vector.load %arg2[%c15, %c0_34] : memref<22x256xf32, #tpu.memory_space<vmem>>, vector<1x128xf32>
    %110 = vector.broadcast %109 : vector<1x128xf32> to vector<16x128xf32>
    %111 = arith.addf %108, %110 : vector<16x128xf32>
    %c16 = arith.constant 16 : index
    %c0_35 = arith.constant 0 : index
    %112 = vector.load %arg2[%c16, %c0_35] : memref<22x256xf32, #tpu.memory_space<vmem>>, vector<1x128xf32>
    %113 = vector.broadcast %112 : vector<1x128xf32> to vector<16x128xf32>
    %114 = arith.mulf %6, %113 : vector<16x128xf32>
    %c17 = arith.constant 17 : index
    %c0_36 = arith.constant 0 : index
    %115 = vector.load %arg2[%c17, %c0_36] : memref<22x256xf32, #tpu.memory_space<vmem>>, vector<1x128xf32>
    %116 = vector.broadcast %115 : vector<1x128xf32> to vector<16x128xf32>
    %117 = arith.addf %114, %116 : vector<16x128xf32>
    %cst_37 = arith.constant dense<0.000000e+00> : vector<128xf32>
    %118 = vector.multi_reduction <add>, %117, %cst_37 [0] : vector<16x128xf32> to vector<128xf32>
    %119 = vector.shape_cast %118 : vector<128xf32> to vector<1x128xf32>
    %cst_38 = arith.constant dense<0.000000e+00> : vector<1x128xf32>
    %120 = tpu.matmul %119, %0, %cst_38 {dimension_numbers = #tpu.dot_dimension_numbers<[1], [0], [0], [1], [0, 0, 1, 1], [], []>} : vector<1x128xf32>, vector<128x128xf32>, vector<1x128xf32> -> vector<1x128xf32>
    %121 = vector.broadcast %120 : vector<1x128xf32> to vector<16x128xf32>
    %122 = arith.subf %117, %121 : vector<16x128xf32>
    %123 = arith.mulf %122, %122 : vector<16x128xf32>
    %cst_39 = arith.constant dense<0.000000e+00> : vector<128xf32>
    %124 = vector.multi_reduction <add>, %123, %cst_39 [0] : vector<16x128xf32> to vector<128xf32>
    %125 = vector.shape_cast %124 : vector<128xf32> to vector<1x128xf32>
    %cst_40 = arith.constant dense<0.000000e+00> : vector<1x128xf32>
    %126 = tpu.matmul %125, %0, %cst_40 {dimension_numbers = #tpu.dot_dimension_numbers<[1], [0], [0], [1], [0, 0, 1, 1], [], []>} : vector<1x128xf32>, vector<128x128xf32>, vector<1x128xf32> -> vector<1x128xf32>
    %cst_41 = arith.constant 9.99999974E-6 : f32
    %127 = vector.broadcast %cst_41 : f32 to vector<1x128xf32>
    %128 = arith.addf %126, %127 : vector<1x128xf32>
    %129 = math.rsqrt %128 : vector<1x128xf32>
    %130 = vector.broadcast %129 : vector<1x128xf32> to vector<16x128xf32>
    %131 = arith.mulf %122, %130 : vector<16x128xf32>
    %c18 = arith.constant 18 : index
    %c0_42 = arith.constant 0 : index
    %132 = vector.load %arg2[%c18, %c0_42] : memref<22x256xf32, #tpu.memory_space<vmem>>, vector<1x128xf32>
    %133 = vector.broadcast %132 : vector<1x128xf32> to vector<16x128xf32>
    %134 = arith.mulf %131, %133 : vector<16x128xf32>
    %c19 = arith.constant 19 : index
    %c0_43 = arith.constant 0 : index
    %135 = vector.load %arg2[%c19, %c0_43] : memref<22x256xf32, #tpu.memory_space<vmem>>, vector<1x128xf32>
    %136 = vector.broadcast %135 : vector<1x128xf32> to vector<16x128xf32>
    %137 = arith.addf %134, %136 : vector<16x128xf32>
    %138 = tpu.concatenate %111, %137 in 1 : vector<16x128xf32>, vector<16x128xf32> -> vector<16x256xf32>
    %c0_44 = arith.constant 0 : index
    %c0_45 = arith.constant 0 : index
    %139 = vector.load %arg4[%c0_44, %c0_45] : memref<256x256xf32, #tpu.memory_space<vmem>>, vector<256x256xf32>
    %cst_46 = arith.constant dense<0.000000e+00> : vector<16x256xf32>
    %140 = tpu.matmul %138, %139, %cst_46 {dimension_numbers = #tpu.dot_dimension_numbers<[1], [0], [0], [1], [0, 0, 1, 1], [], []>} : vector<16x256xf32>, vector<256x256xf32>, vector<16x256xf32> -> vector<16x256xf32>
    %c21 = arith.constant 21 : index
    %c0_47 = arith.constant 0 : index
    %141 = vector.load %arg2[%c21, %c0_47] : memref<22x256xf32, #tpu.memory_space<vmem>>, vector<1x256xf32>
    %142 = vector.broadcast %141 : vector<1x256xf32> to vector<16x256xf32>
    %143 = arith.addf %140, %142 : vector<16x256xf32>
    %c0_48 = arith.constant 0 : index
    %c0_49 = arith.constant 0 : index
    %c0_50 = arith.constant 0 : index
    %144 = vector.load %arg6[%c0_48, %c0_49, %c0_50] : memref<1x16x256xf32, #tpu.memory_space<vmem>>, vector<1x16x256xf32>
    %145 = vector.shape_cast %144 : vector<1x16x256xf32> to vector<16x256xf32>
    %146 = vector.shape_cast %143 : vector<16x256xf32> to vector<1x16x256xf32>
    tpu.vector_store %arg6[%c0_48, %c0_49, %c0_50], %146 {strides = array<i32>} : memref<1x16x256xf32, #tpu.memory_space<vmem>>, vector<1x16x256xf32>,
    return
  }
  func.func @transform_0(%arg0: i32) -> (i32, i32, i32) {
    %c0_i32 = arith.constant 0 : i32
    %c0_i32_0 = arith.constant 0 : i32
    %c0_i32_1 = arith.constant 0 : i32
    return %arg0, %c0_i32, %c0_i32_0 : i32, i32, i32
  }
  func.func @transform_1(%arg0: i32) -> (i32, i32) {
    %c0_i32 = arith.constant 0 : i32
    %c0_i32_0 = arith.constant 0 : i32
    %c0_i32_1 = arith.constant 0 : i32
    return %c0_i32, %c0_i32_0 : i32, i32
  }
  func.func @transform_2(%arg0: i32) -> (i32, i32) {
    %c0_i32 = arith.constant 0 : i32
    %c0_i32_0 = arith.constant 0 : i32
    %c0_i32_1 = arith.constant 0 : i32
    return %c0_i32, %c0_i32_0 : i32, i32
  }
  func.func @transform_3(%arg0: i32) -> (i32, i32) {
    %c0_i32 = arith.constant 0 : i32
    %c0_i32_0 = arith.constant 0 : i32
    %c0_i32_1 = arith.constant 0 : i32
    return %c0_i32, %c0_i32_0 : i32, i32
  }
  func.func @transform_4(%arg0: i32) -> (i32, i32) {
    %c0_i32 = arith.constant 0 : i32
    %c0_i32_0 = arith.constant 0 : i32
    %c0_i32_1 = arith.constant 0 : i32
    return %c0_i32, %c0_i32_0 : i32, i32
  }
  func.func @transform_5(%arg0: i32) -> (i32, i32, i32) {
    %c0_i32 = arith.constant 0 : i32
    %c0_i32_0 = arith.constant 0 : i32
    %c0_i32_1 = arith.constant 0 : i32
    return %arg0, %c0_i32, %c0_i32_0 : i32, i32, i32
  }
}

</mosaic_0001>

<bundles_post_ra>
// kernel: tile.122
= control target key start
LH: loop header
LB: loop body
LE: loop exit
PB: predicated region body
PF: predicated region fallthrough
CT: control target
= control target key end

     0   :  { %s28_s0 = inlined_call_operand.vmem [shape: f32[8], index: 0, kind: input, shape index: {}]   ;;  %s29_s1 = inlined_call_operand.vmem [shape: f32[16,8], index: 1, kind: output, shape index: {}]  }
   0x1   :  { %v4_v0 = vld [vmem:[%s28_s0] ss:$0 sm:$0xff] }
   0x2   :  { %5 = vst [vmem:[%s29_s1] sm:$0xff] %v4_v0  ;;  %8 = vst [vmem:[%s29_s1 + $0x8] sm:$0xff] %v4_v0 }

// kernel: tile.123
= control target key start
LH: loop header
LB: loop body
LE: loop exit
PB: predicated region body
PF: predicated region fallthrough
CT: control target
= control target key end

     0   :  { %s133_s10 = smov 120   ;;  %s134_s11 = smov 104   ;;  %vm3_vm0 = vcmask 64512   ;;  %vm9_vm1 = vcmask 1048512   ;;  %vm15_vm2 = vcmask 982912   ;;  %vm21_vm3 = vcmask 917312   ;;  %s209_s0 = inlined_call_operand.vmem [shape: f32[16,8], index: 0, kind: input, shape index: {}]   ;;  %s210_s1 = inlined_call_operand.vmem [shape: f32[128], index: 1, kind: output, shape index: {}]  }
   0x1   :  { %v103_v0 = vld [vmem:[%s209_s0 + $0xf] sm:$0x1]   ;;  %v105_v1 = vld [vmem:[%s209_s0 + $0xd] sm:$0x1]   ;;  %v104_v2 = vld [vmem:[%s209_s0 + $0xe] sm:$0x1]  }
   0x2   :  { %7 = vrot.lane.b32.xlu0 %v103_v0, %s133_s10  ;;  %19 = vrot.lane.b32.xlu1 %v105_v1, %s134_s11  ;;  %v106_v3 = vld [vmem:[%s209_s0 + $0xc] sm:$0x1]   ;;  %s135_s16 = smov 112   ;;  %s136_s17 = smov 96   ;;  %v107_v4 = vld [vmem:[%s209_s0 + $0xb] sm:$0x1]  }
   0x3   :  { %v108_v5 = vld [vmem:[%s209_s0 + $0xa] sm:$0x1]   ;;  %v2_v6 = vld [vmem:[%s209_s0] sm:$0x1]   ;;  %s137_s24 = smov 88   ;;  %s138_s25 = smov 80  }
   0x4   :  { %4 = vst.msk [vmem:[#allocation0] sm:$0x1] %vm3_vm0, %v2_v6   ;;  %v109_v7 = vld [vmem:[%s209_s0 + $0x9] sm:$0x1]   ;;  %v110_v8 = vld [vmem:[%s209_s0 + $0x8] sm:$0x1]  }
   0x5   :  { %s139_s30 = smov 72   ;;  %s140_s2 = smov 64   ;;  %v111_v9 = vld [vmem:[%s209_s0 + $0x7] sm:$0x1]   ;;  %v112_v10 = vld [vmem:[%s209_s0 + $0x6] sm:$0x1]  }
   0x6   :  { %13 = vrot.lane.b32.xlu0 %v104_v2, %s135_s16  ;;  %25 = vrot.lane.b32.xlu1 %v106_v3, %s136_s17  ;;  %s141_s7 = smov 56   ;;  %s142_s8 = smov 48   ;;  %v113_v11 = vld [vmem:[%s209_s0 + $0x5] sm:$0x1]   ;;  %v114_v12 = vld [vmem:[%s209_s0 + $0x4] sm:$0x1]  }
   0x7   :  { %s143_s13 = smov 40   ;;  %s144_s14 = smov 32   ;;  %v115_v13 = vld [vmem:[%s209_s0 + $0x3] sm:$0x1]   ;;  %v116_v14 = vld [vmem:[%s209_s0 + $0x2] sm:$0x1]  }
   0x8   :  { %s145_s19 = smov 24   ;;  %s146_s20 = smov 16   ;;  %v117_v15 = vld [vmem:[%s209_s0 + $0x1] sm:$0x1]   ;;  %vm27_vm4 = vcmask 851712   ;;  %vm33_vm5 = vcmask 786112  }
   0x9   :  { %s147_s0 = smov 8   ;;  %vm39_vm6 = vcmask 720512   ;;  %vm45_vm7 = vcmask 654912   ;;  %vm51_vm8 = vcmask 589312   ;;  %vm57_vm9 = vcmask 523712  }
   0xa   :  { %31 = vrot.lane.b32.xlu0 %v107_v4, %s137_s24  ;;  %37 = vrot.lane.b32.xlu1 %v108_v5, %s138_s25  ;;  %vm63_vm10 = vcmask 458112   ;;  %vm69_vm11 = vcmask 392512   ;;  %vm75_vm12 = vcmask 326912   ;;  %vm81_vm13 = vcmask 261312  }
   0xb   :  { %vm87_vm14 = vcmask 195712   ;;  %vm93_vm15 = vcmask 130112  }
   0xe   :  { %43 = vrot.lane.b32.xlu0 %v109_v7, %s139_s30  ;;  %49 = vrot.lane.b32.xlu1 %v110_v8, %s140_s2 }
  0x12   :  { %55 = vrot.lane.b32.xlu0 %v111_v9, %s141_s7  ;;  %61 = vrot.lane.b32.xlu1 %v112_v10, %s142_s8 }
  0x16   :  { %67 = vrot.lane.b32.xlu0 %v113_v11, %s143_s13  ;;  %73 = vrot.lane.b32.xlu1 %v114_v12, %s144_s14 }
  0x1a   :  { %79 = vrot.lane.b32.xlu0 %v115_v13, %s145_s19  ;;  %85 = vrot.lane.b32.xlu1 %v116_v14, %s146_s20 }
  0x1e   :  { %91 = vrot.lane.b32.xlu0 %v117_v15, %s147_s0 }
  0x74   :  { %v8_v16 = vpop.permute.xlu0 %7   ;;  %v20_v17 = vpop.permute.xlu1 %19  }
  0x75   :  { %10 = vst.msk [vmem:[#allocation0] sm:$0x1] %vm9_vm1, %v8_v16  }
  0x78   :  { %v14_v18 = vpop.permute.xlu0 %13   ;;  %v26_v19 = vpop.permute.xlu1 %25  }
  0x79   :  { %16 = vst.msk [vmem:[#allocation0] sm:$0x1] %vm15_vm2, %v14_v18  }
  0x7a   :  { %22 = vst.msk [vmem:[#allocation0] sm:$0x1] %vm21_vm3, %v20_v17  }
  0x7b   :  { %28 = vst.msk [vmem:[#allocation0] sm:$0x1] %vm27_vm4, %v26_v19  }
  0x7c   :  { %v32_v20 = vpop.permute.xlu0 %31   ;;  %v38_v21 = vpop.permute.xlu1 %37  }
  0x7d   :  { %34 = vst.msk [vmem:[#allocation0] sm:$0x1] %vm33_vm5, %v32_v20  }
  0x7e   :  { %40 = vst.msk [vmem:[#allocation0] sm:$0x1] %vm39_vm6, %v38_v21  }
  0x80   :  { %v44_v22 = vpop.permute.xlu0 %43   ;;  %v50_v23 = vpop.permute.xlu1 %49  }
  0x81   :  { %46 = vst.msk [vmem:[#allocation0] sm:$0x1] %vm45_vm7, %v44_v22  }
  0x82   :  { %52 = vst.msk [vmem:[#allocation0] sm:$0x1] %vm51_vm8, %v50_v23  }
  0x84   :  { %v56_v24 = vpop.permute.xlu0 %55   ;;  %v62_v25 = vpop.permute.xlu1 %61  }
  0x85   :  { %58 = vst.msk [vmem:[#allocation0] sm:$0x1] %vm57_vm9, %v56_v24  }
  0x86   :  { %64 = vst.msk [vmem:[#allocation0] sm:$0x1] %vm63_vm10, %v62_v25  }
  0x88   :  { %v68_v26 = vpop.permute.xlu0 %67   ;;  %v74_v27 = vpop.permute.xlu1 %73  }
  0x89   :  { %70 = vst.msk [vmem:[#allocation0] sm:$0x1] %vm69_vm11, %v68_v26  }
  0x8a   :  { %76 = vst.msk [vmem:[#allocation0] sm:$0x1] %vm75_vm12, %v74_v27  }
  0x8c   :  { %v80_v28 = vpop.permute.xlu0 %79   ;;  %v86_v29 = vpop.permute.xlu1 %85  }
  0x8d   :  { %82 = vst.msk [vmem:[#allocation0] sm:$0x1] %vm81_vm13, %v80_v28  }
  0x8e   :  { %88 = vst.msk [vmem:[#allocation0] sm:$0x1] %vm87_vm14, %v86_v29  }
  0x90   :  { %v92_v30 = vpop.permute.xlu0 %91  }
  0x91   :  { %94 = vst.msk [vmem:[#allocation0] sm:$0x1] %vm93_vm15, %v92_v30  }
  0x98   :  { %v99_v31 = vld [vmem:[#allocation0] sm:$0x1] }
  0x99   :  { %102 = vst [vmem:[%s210_s1] sm:$0x1] %v99_v31 }

// kernel: lightweight_dga.1
= control target key start
LH: loop header
LB: loop body
LE: loop exit
PB: predicated region body
PF: predicated region fallthrough
CT: control target
= control target key end

     0   :  { %s2204_s18 = smov 0   ;;  %s3260_s0 = inlined_call_operand.vmem [shape: f32[2,18,144], index: 0, kind: input, shape index: {}]   ;;  %s3261_s1 = inlined_call_operand.vmem [shape: f32[22,256], index: 1, kind: input, shape index: {}]   ;;  %s3262_s2 = inlined_call_operand.vmem [shape: f32[128,256], index: 2, kind: input, shape index: {}]   ;;  %s3263_s3 = inlined_call_operand.vmem [shape: f32[256,256], index: 3, kind: input, shape index: {}]   ;;  %s3264_s4 = inlined_call_operand.vmem [shape: f32[128,128], index: 4, kind: input, shape index: {}]   ;;  %s3265_s5 = inlined_call_operand.vmem [shape: f32[2,16,256], index: 5, kind: output, shape index: {}]  }
   0x1 LB: > { %s1746_s19 = sadd.s32 4294967295, %s2167_s18   ;;  %p1750_p0 = scmp.ge.s32.totalorder %s2167_s18, 1  ;;  %s2167_s18 = sphi %s2204_s18, %s15_s18  }
   0x2   : > { %p187_p1 = scmp.lt.s32.totalorder %s2167_s18, 3 }
   0x4   : > { %p188_p2 = pnand %p1750_p0, %p187_p1 }
   0x5   : > { %s2169_s22 = smov (!%p188_p2), 16   ;;  %p215_p3 = scmp.lt.s32.totalorder (!%p188_p2), %s1746_s19, 1 }
   0x6   : > { %191 = sbr.rel (%p188_p2) target bundleno = 2729 (0xaa9), region = 40  ;;  %s2170_s30 = smov (!%p188_p2), 8  }
   0x7   : > { %s2171_s21 = smov (!%p188_p2), 120  }
   0xb   : > { %v313_v0 = vld [vmem:[%s3261_s1 + $0x2] ss:$0 sm:$0xff]  ;;  %v493_v1 = vld [vmem:[%s3261_s1 + $0x10] ss:$0 sm:$0xff]  ;;  %v382_v2 = vld [vmem:[%s3261_s1 + $0x5] ss:$0 sm:$0xff] }
   0xc   : > { %315 = vrot.lane.b32.xlu0 %v313_v0, %s2169_s22  ;;  %495 = vrot.lane.b32.xlu1 %v493_v1, %s2169_s22  ;;  %v282_v3 = vld [vmem:[%s3261_s1 + $0x1] ss:$0 sm:$0xff]  ;;  %s3267_s19 = smov (!%p215_p3, %s1746_s19), 1  ;;  %v258_v4 = vld [vmem:[%s3261_s1] ss:$0 sm:$0xff]  ;;  %vm263_vm0 = vcmask 1040384  }
   0xd   : > { %s2073_s29 = smul.u32 48, %s3267_s19  ;;  %v247_v5 = vld [vmem:[%s3261_s1 + $0x4] ss:$0 sm:$0xff]  ;;  %v360_v12 = vld [vmem:[%s3261_s1 + $0x3] ss:$0 sm:$0xff]  ;;  %vm433_vm1 = vcmask 1046528  }
   0xe   : > { %v426_v13 = vld [vmem:[%s3261_s1 + $0x6] ss:$0 sm:$0xff]  ;;  %v454_v24 = vld [vmem:[%s3261_s1 + $0x7] ss:$0 sm:$0xff]  ;;  %vm344_vm2 = vcmask 982016   ;;  %vm578_vm3 = vcmask 1047616  }
   0xf   : > { %s2237_s12 = scalar_lea.vmem %s3260_s0, %s2073_s29  ;;  %vm588_vm4 = vcmask 64512   ;;  %vm2173_vm5 = vmmov 0   ;;  %s1760_s25 = sshll.u32 %s3267_s19, 5 }
  0x10   : > { %384 = vrot.lane.b32.xlu0 %v382_v2, %s2169_s22  ;;  %284 = vrot.lane.b32.xlu1 %v282_v3, %s2170_s30  ;;  %v2240_v6 = vld [vmem:[%s2237_s12] sm:$0xff]  ;;  %v2243_v7 = vld [vmem:[%s2237_s12 + $0x10] sm:$0xff] }
  0x11   : > { %v259_v8 = vmul.f32 %v258_v4, %v2240_v6  ;;  %v260_v9 = vmul.f32 %v258_v4, %v2243_v7  ;;  %v361_v15 = vmul.f32 %v360_v12, %v2240_v6  ;;  %v2259_v16 = vld [vmem:[%s2237_s12 + $0x20] sm:$0x3]  ;;  %v427_v17 = vmul.f32 %v426_v13, %v2240_v6  ;;  %v2280_v30 = vld [vmem:[%s2237_s12 + $0x8] sm:$0xff]  ;;  %v2287_v33 = vld [vmem:[%s2237_s12 + $0x18] sm:$0xff] }
  0x12   : > { %v428_v18 = vmul.f32 %v426_v13, %v2243_v7  ;;  %v362_v19 = vmul.f32 %v360_v12, %v2243_v7  ;;  %v363_v20 = vmul.f32 %v360_v12, %v2259_v16  ;;  %v429_v21 = vmul.f32 %v426_v13, %v2259_v16  ;;  %v2292_v36 = vld [vmem:[%s2237_s12 + $0x28] sm:$0x3]  ;;  %v547_v2 = vld [vmem:[%s3261_s1 + $0x11] ss:$0 sm:$0xff]  ;;  %v2335_v3 = vld [vmem:[%s3264_s4 + $0x78] sm:$0xff] }
  0x13   : > { %v264_v10 = vrot.slane %v259_v8, 7  ;;  %v265_v11 = vrot.slane %v260_v9, 7  ;;  %v434_v22 = vrot.slane %v427_v17, 1  ;;  %v2172_v4 = vmov 0.0   ;;  %v2350_v8 = vld [vmem:[%s3264_s4 + $0x68] sm:$0xff]  ;;  %v2359_v9 = vld [vmem:[%s3264_s4 + $0x60] sm:$0xff] }
  0x14   : > { %249 = vrot.lane.b32.xlu0 %v247_v5, %s2170_s30  ;;  %v435_v23 = vrot.slane %v428_v18, 1  ;;  %v437_v25 = vrot.slane %v429_v21, 1  ;;  %1863 = vmatprep.subr.mxu0 %v2172_v4  ;;  %v2341_v5 = vld [vmem:[%s3264_s4 + $0x70] sm:$0xff]  ;;  %v2386_v12 = vld [vmem:[%s3264_s4 + $0x48] sm:$0xff]  ;;  %v2395_v13 = vld [vmem:[%s3264_s4 + $0x40] sm:$0xff] }
  0x15   : > { %267 = vrot.lane.b32.xlu1 %v264_v10, %s2170_s30  ;;  %v266_v14 = vsel %vm263_vm0, %v264_v10, %v265_v11  ;;  %1933 = vmatprep.subr.mxu1 %v2172_v4  ;;  %v2368_v10 = vld [vmem:[%s3264_s4 + $0x58] sm:$0xff]  ;;  %v2422_v17 = vld [vmem:[%s3264_s4 + $0x28] sm:$0xff]  ;;  %v2431_v18 = vld [vmem:[%s3264_s4 + $0x20] sm:$0xff] }
  0x16   : > { %v436_v26 = vsel %vm433_vm1, %v434_v22, %v435_v23  ;;  %v438_v27 = vsel %vm433_vm1, %v435_v23, %v437_v25  ;;  %1864 = vmatpush3.msra.mxu0 %v2335_v3  ;;  %1934 = vmatpush3.msra.mxu1 %v2335_v3 }
  0x17   : > { %1865 = vmatprep.subr.mxu0 %v2172_v4  ;;  %1935 = vmatprep.subr.mxu1 %v2172_v4 }
  0x18   : > { %269 = vrot.lane.b32.xlu0 %v266_v14, %s2170_s30  ;;  %1866 = vmatpush3.msra.mxu0 %v2341_v5  ;;  %v2404_v14 = vld [vmem:[%s3264_s4 + $0x38] sm:$0xff] }
  0x19   : > { %271 = vrot.lane.b32.xlu1 %v265_v11, %s2170_s30  ;;  %1936 = vmatpush3.msra.mxu1 %v2341_v5  ;;  %v2377_v11 = vld [vmem:[%s3264_s4 + $0x50] sm:$0xff] }
  0x1a   : > { %1867 = vmatprep.subr.mxu0 %v2172_v4  ;;  %1937 = vmatprep.subr.mxu1 %v2172_v4 }
  0x1b   : > { %1868 = vmatpush3.msra.mxu0 %v2350_v8  ;;  %1938 = vmatpush3.msra.mxu1 %v2350_v8 }
  0x1c   : > { %367 = vrot.lane.b32.xlu0 %v361_v15, %s2170_s30  ;;  %1869 = vmatprep.subr.mxu0 %v2172_v4  ;;  %v2413_v15 = vld [vmem:[%s3264_s4 + $0x30] sm:$0xff] }
  0x1d   : > { %369 = vrot.lane.b32.xlu1 %v362_v19, %s2170_s30  ;;  %1939 = vmatprep.subr.mxu1 %v2172_v4  ;;  %v2440_v19 = vld [vmem:[%s3264_s4 + $0x18] sm:$0xff] }
  0x1e   : > { %1870 = vmatpush3.msra.mxu0 %v2359_v9  ;;  %1940 = vmatpush3.msra.mxu1 %v2359_v9 }
  0x1f   : > { %1871 = vmatprep.subr.mxu0 %v2172_v4  ;;  %1941 = vmatprep.subr.mxu1 %v2172_v4 }
  0x20   : > { %371 = vrot.lane.b32.xlu0 %v363_v20, %s2170_s30  ;;  %1872 = vmatpush3.msra.mxu0 %v2368_v10  ;;  %v2449_v20 = vld [vmem:[%s3264_s4 + $0x10] sm:$0xff] }
  0x21   : > { %456 = vrot.lane.b32.xlu1 %v454_v24, %s2170_s30  ;;  %1942 = vmatpush3.msra.mxu1 %v2368_v10 }
  0x22   : > { %1873 = vmatprep.subr.mxu0 %v2172_v4  ;;  %1943 = vmatprep.subr.mxu1 %v2172_v4 }
  0x23   : > { %1874 = vmatpush3.msra.mxu0 %v2377_v11  ;;  %1944 = vmatpush3.msra.mxu1 %v2377_v11 }
  0x24   : > { %439 = vrot.lane.b32.xlu0 %v436_v26, %s2170_s30  ;;  %1875 = vmatprep.subr.mxu0 %v2172_v4 }
  0x25   : > { %441 = vrot.lane.b32.xlu1 %v438_v27, %s2170_s30  ;;  %1945 = vmatprep.subr.mxu1 %v2172_v4 }
  0x26   : > { %1876 = vmatpush3.msra.mxu0 %v2386_v12  ;;  %1946 = vmatpush3.msra.mxu1 %v2386_v12 }
  0x27   : > { %1877 = vmatprep.subr.mxu0 %v2172_v4  ;;  %1947 = vmatprep.subr.mxu1 %v2172_v4 }
  0x28   : > { %443 = vrot.lane.b32.xlu0 %v437_v25, %s2170_s30  ;;  %1878 = vmatpush3.msra.mxu0 %v2395_v13 }
  0x29   : > { %1948 = vmatpush3.msra.mxu1 %v2395_v13  ;;  %1879 = vmatprep.subr.mxu0 %v2172_v4 }
  0x2a   : > { %1949 = vmatprep.subr.mxu1 %v2172_v4  ;;  %1880 = vmatpush3.msra.mxu0 %v2404_v14 }
  0x2b   : > { %1950 = vmatpush3.msra.mxu1 %v2404_v14  ;;  %1881 = vmatprep.subr.mxu0 %v2172_v4 }
  0x2c   : > { %1951 = vmatprep.subr.mxu1 %v2172_v4  ;;  %1882 = vmatpush3.msra.mxu0 %v2413_v15 }
  0x2d   : > { %1952 = vmatpush3.msra.mxu1 %v2413_v15  ;;  %1883 = vmatprep.subr.mxu0 %v2172_v4 }
  0x2e   : > { %1953 = vmatprep.subr.mxu1 %v2172_v4  ;;  %1884 = vmatpush3.msra.mxu0 %v2422_v17 }
  0x2f   : > { %1954 = vmatpush3.msra.mxu1 %v2422_v17  ;;  %1885 = vmatprep.subr.mxu0 %v2172_v4 }
  0x30   : > { %1955 = vmatprep.subr.mxu1 %v2172_v4  ;;  %1886 = vmatpush3.msra.mxu0 %v2431_v18 }
  0x31   : > { %1956 = vmatpush3.msra.mxu1 %v2431_v18  ;;  %1887 = vmatprep.subr.mxu0 %v2172_v4 }
  0x32   : > { %1957 = vmatprep.subr.mxu1 %v2172_v4  ;;  %1888 = vmatpush3.msra.mxu0 %v2440_v19 }
  0x33   : > { %1958 = vmatpush3.msra.mxu1 %v2440_v19  ;;  %1889 = vmatprep.subr.mxu0 %v2172_v4 }
  0x34   : > { %1959 = vmatprep.subr.mxu1 %v2172_v4  ;;  %1890 = vmatpush3.msra.mxu0 %v2449_v20 }
  0x35   : > { %1960 = vmatpush3.msra.mxu1 %v2449_v20  ;;  %1891 = vmatprep.subr.mxu0 %v2172_v4 }
  0x36   : > { %1961 = vmatprep.subr.mxu1 %v2172_v4  ;;  %1895 = vmatprep.mubr.msk.f32.mxu0 %vm2173_vm5, %v2172_v4 }
  0x37   : > { %1965 = vmatprep.mubr.msk.f32.mxu1 %vm2173_vm5, %v2172_v4 }
  0x7e   : > { %v316_v28 = vpop.permute.xlu0 %315  ;;  %v496_v45 = vpop.permute.xlu1 %495 }
  0x7f   : > { %v319_v39 = vmul.f32 %v316_v28, %v2280_v30  ;;  %v318_v40 = vmul.f32 %v316_v28, %v2240_v6  ;;  %v321_v43 = vmul.f32 %v316_v28, %v2287_v33  ;;  %v320_v44 = vmul.f32 %v316_v28, %v2243_v7 }
  0x80   : > { %v499_v46 = vmul.f32 %v496_v45, %v2280_v30  ;;  %v501_v47 = vmul.f32 %v496_v45, %v2287_v33  ;;  %v502_v50 = vmul.f32 %v496_v45, %v2259_v16  ;;  %v498_v53 = vmul.f32 %v496_v45, %v2240_v6 }
  0x81   : > { %v327_v41 = vrot.slane %v319_v39, 7  ;;  %v326_v42 = vrot.slane %v318_v40, 7  ;;  %v330_v48 = vrot.slane %v321_v43, 7  ;;  %v328_v49 = vrot.slane %v320_v44, 7 }
  0x82   : > { %v385_v29 = vpop.permute.xlu0 %384  ;;  %v513_v51 = vrot.slane %v499_v46, 1  ;;  %v514_v52 = vrot.slane %v501_v47, 1  ;;  %v500_v56 = vmul.f32 %v496_v45, %v2243_v7  ;;  %v503_v57 = vmul.f32 %v496_v45, %v2292_v36  ;;  %v285_v22 = vpop.permute.xlu1 %284 }
  0x83   : > { %v387_v31 = vmul.f32 %v385_v29, %v2240_v6  ;;  %v388_v32 = vmul.f32 %v385_v29, %v2280_v30  ;;  %v389_v34 = vmul.f32 %v385_v29, %v2243_v7  ;;  %v390_v35 = vmul.f32 %v385_v29, %v2287_v33 }
  0x84   : > { %v391_v37 = vmul.f32 %v385_v29, %v2259_v16  ;;  %v392_v38 = vmul.f32 %v385_v29, %v2292_v36  ;;  %v331_v54 = vsel %vm263_vm0, %v327_v41, %v330_v48  ;;  %v329_v55 = vsel %vm263_vm0, %v326_v42, %v328_v49 }
  0x85   : > { %399 = vrot.lane.b32.xlu1 %v387_v31, %s2171_s21  ;;  %401 = vrot.lane.b32.xlu0 %v388_v32, %s2171_s21  ;;  %v516_v58 = vrot.slane %v502_v50, 1  ;;  %v515_v59 = vsel %vm433_vm1, %v513_v51, %v514_v52  ;;  %v510_v60 = vrot.slane %v498_v53, 1  ;;  %v511_v61 = vrot.slane %v500_v56, 1 }
  0x86   : > { %v518_v62 = vrot.slane %v503_v57, 1  ;;  %v250_v21 = vpop.permute.xlu0 %249  ;;  %v287_v40 = vmul.f32 %v285_v22, %v2240_v6  ;;  %v290_v45 = vmul.f32 %v285_v22, %v2287_v33 }
  0x87   : > { %v512_v63 = vsel %vm433_vm1, %v510_v60, %v511_v61  ;;  %v517_v1 = vsel %vm433_vm1, %v511_v61, %v516_v58  ;;  %v268_v24 = vpop.permute.xlu1 %267  ;;  %v253_v43 = vmul.f32 %v250_v21, %v2280_v30  ;;  %v252_v44 = vmul.f32 %v250_v21, %v2240_v6 }
  0x88   : > { %v519_v0 = vsel %vm433_vm1, %v514_v52, %v518_v62  ;;  %v256_v46 = vmul.f32 %v250_v21, %v2259_v16  ;;  %v257_v47 = vmul.f32 %v250_v21, %v2292_v36  ;;  %v295_v50 = vrot.slane %v287_v40, 7 }
  0x89   : > { %403 = vrot.lane.b32.xlu1 %v389_v34, %s2171_s21  ;;  %405 = vrot.lane.b32.xlu0 %v390_v35, %s2171_s21  ;;  %v255_v52 = vmul.f32 %v250_v21, %v2287_v33  ;;  %v277_v53 = vadd.f32 %v268_v24, %v253_v43  ;;  %v299_v61 = vrot.slane %v290_v45, 7 }
  0x8a   : > { %v270_v23 = vpop.permute.xlu0 %269 }
  0x8b   : > { %v272_v26 = vpop.permute.xlu1 %271 }
  0x8c   : > { %v280_v56 = vadd.f32 %v272_v26, %v256_v46  ;;  %v281_v57 = vadd.f32 %v272_v26, %v257_v47 }
  0x8d   : > { %407 = vrot.lane.b32.xlu1 %v391_v37, %s2171_s21  ;;  %409 = vrot.lane.b32.xlu0 %v392_v38, %s2171_s21 }
  0x8e   : > { %v368_v25 = vpop.permute.xlu0 %367  ;;  %v312_v40 = vadd.f32 %v299_v61, %v281_v57 }
  0x8f   : > { %v2460_v27 = vpop.permute.xlu1 %369 }
  0x91   : > { %334 = vrot.lane.b32.xlu1 %v327_v41, %s2171_s21  ;;  %332 = vrot.lane.b32.xlu0 %v326_v42, %s2171_s21  ;;  %v289_v41 = vmul.f32 %v285_v22, %v2243_v7  ;;  %v288_v42 = vmul.f32 %v285_v22, %v2280_v30 }
  0x92   : > { %v372_v28 = vpop.permute.xlu0 %371 }
  0x93   : > { %v2462_v29 = vpop.permute.xlu1 %456  ;;  %v297_v51 = vrot.slane %v289_v41, 7 }
  0x95   : > { %342 = vrot.lane.b32.xlu1 %v330_v48, %s2171_s21  ;;  %340 = vrot.lane.b32.xlu0 %v328_v49, %s2171_s21  ;;  %v298_v26 = vsel %vm263_vm0, %v295_v50, %v297_v51 }
  0x96   : > { %v2464_v31 = vpop.permute.xlu0 %439 }
  0x97   : > { %v2466_v32 = vpop.permute.xlu1 %441 }
  0x99   : > { %338 = vrot.lane.b32.xlu1 %v331_v54, %s2171_s21  ;;  %336 = vrot.lane.b32.xlu0 %v329_v55, %s2171_s21  ;;  %v296_v54 = vrot.slane %v288_v42, 7  ;;  %v276_v55 = vadd.f32 %v268_v24, %v252_v44 }
  0x9a   : > { %v2468_v34 = vpop.permute.xlu0 %443 }
  0x9b   : > { %v300_v24 = vsel %vm263_vm0, %v296_v54, %v299_v61  ;;  %v464_v61 = vmul.f32 %v2462_v29, %v2292_v36  ;;  %v459_v36 = vmul.f32 %v2462_v29, %v2240_v6 }
  0x9d   : > { %528 = vrot.lane.b32.xlu1 %v516_v58, %s2171_s21  ;;  %522 = vrot.lane.b32.xlu0 %v515_v59, %s2171_s21  ;;  %v254_v58 = vmul.f32 %v250_v21, %v2243_v7 }
  0x9f   : > { %v278_v22 = vadd.f32 %v270_v23, %v254_v58 }
  0xa1   : > { %520 = vrot.lane.b32.xlu1 %v512_v63, %s2171_s21  ;;  %526 = vrot.lane.b32.xlu0 %v519_v0, %s2171_s21  ;;  %v279_v63 = vadd.f32 %v270_v23, %v255_v52  ;;  %v308_v0 = vadd.f32 %v296_v54, %v277_v53  ;;  %v460_v23 = vmul.f32 %v2462_v29, %v2280_v30 }
  0xa2   : > { %v461_v30 = vmul.f32 %v2462_v29, %v2243_v7 }
  0xa3   : > { %v310_v47 = vadd.f32 %v300_v24, %v279_v63  ;;  %v474_v24 = vrot.slane %v460_v23, 1 }
  0xa5   : > { %524 = vrot.lane.b32.xlu1 %v517_v1, %s2171_s21  ;;  %530 = vrot.lane.b32.xlu0 %v518_v62, %s2171_s21  ;;  %v307_v1 = vadd.f32 %v295_v50, %v276_v55 }
  0xa9   : > { %549 = vrot.lane.b32.xlu1 %v547_v2, %s2170_s30  ;;  %v311_v2 = vadd.f32 %v297_v51, %v280_v56 }
  0xf7   : > { %v400_v35 = vpop.permute.xlu1 %399  ;;  %v2470_v37 = vpop.permute.xlu0 %401 }
  0xfb   : > { %v2472_v38 = vpop.permute.xlu1 %403  ;;  %v2474_v39 = vpop.permute.xlu0 %405 }
  0xff   : > { %v408_v48 = vpop.permute.xlu1 %407  ;;  %v410_v49 = vpop.permute.xlu0 %409 }
 0x103   : > { %v335_v59 = vpop.permute.xlu1 %334  ;;  %v333_v60 = vpop.permute.xlu0 %332 }
 0x104   : > { %v345_v62 = vsel %vm344_vm2, %v333_v60, %v335_v59  ;;  %v355_v42 = vadd.f32 %v335_v59, %v308_v0  ;;  %v309_v60 = vadd.f32 %v298_v26, %v278_v22  ;;  %v462_v59 = vmul.f32 %v2462_v29, %v2287_v33 }
 0x105   : > { %v354_v21 = vadd.f32 %v345_v62, %v307_v1  ;;  %v413_v62 = vsel %vm344_vm2, %v408_v48, %v410_v49  ;;  %v412_v48 = vsel %vm344_vm2, %v2472_v38, %v2474_v39 }
 0x106   : > { %v377_v56 = vadd.f32 %v368_v25, %v355_v42 }
 0x107   : > { %v343_v41 = vpop.permute.xlu1 %342  ;;  %v341_v43 = vpop.permute.xlu0 %340  ;;  %v376_v57 = vadd.f32 %v368_v25, %v354_v21  ;;  %v463_v25 = vmul.f32 %v2462_v29, %v2259_v16  ;;  %v471_v21 = vrot.slane %v459_v36, 1 }
 0x108   : > { %v347_v44 = vsel %vm344_vm2, %v341_v43, %v343_v41  ;;  %v359_v45 = vadd.f32 %v343_v41, %v312_v40  ;;  %v421_v7 = vadd.f32 %v2470_v37, %v377_v56  ;;  %v479_v43 = vrot.slane %v464_v61, 1 }
 0x109   : > { %v358_v46 = vadd.f32 %v347_v44, %v311_v2  ;;  %v477_v42 = vrot.slane %v463_v25, 1 }
 0x10a   : > { %v381_v50 = vadd.f32 %v372_v28, %v359_v45 }
 0x10b   : > { %v380_v52 = vadd.f32 %v372_v28, %v358_v46  ;;  %v339_v53 = vpop.permute.xlu1 %338  ;;  %v337_v55 = vpop.permute.xlu0 %336  ;;  %v411_v28 = vsel %vm344_vm2, %v400_v35, %v2470_v37  ;;  %v475_v35 = vrot.slane %v462_v59, 1  ;;  %v449_v37 = vadd.f32 %v2464_v31, %v421_v7 }
 0x10c   : > { %v357_v58 = vadd.f32 %v339_v53, %v310_v47  ;;  %v346_v54 = vsel %vm344_vm2, %v337_v55, %v339_v53  ;;  %v420_v22 = vadd.f32 %v411_v28, %v376_v57  ;;  %v425_v40 = vadd.f32 %v410_v49, %v381_v50 }
 0x10d   : > { %v356_v51 = vadd.f32 %v346_v54, %v309_v60  ;;  %v424_v0 = vadd.f32 %v413_v62, %v380_v52  ;;  %v480_v49 = vsel %vm433_vm1, %v475_v35, %v479_v43  ;;  %v476_v46 = vsel %vm433_vm1, %v474_v24, %v475_v35 }
 0x10e   : > { %v379_v63 = vadd.f32 %v2460_v27, %v357_v58  ;;  %v453_v45 = vadd.f32 %v2468_v34, %v425_v40  ;;  %v488_v57 = vadd.f32 %v476_v46, %v449_v37  ;;  %v2555_v37 = vld [vmem:[%s3264_s4 + $0x8] sm:$0xff] }
 0x10f   : > { %v378_v1 = vadd.f32 %v2460_v27, %v356_v51  ;;  %v529_v33 = vpop.permute.xlu1 %528  ;;  %v523_v2 = vpop.permute.xlu0 %522  ;;  %v472_v27 = vrot.slane %v461_v30, 1  ;;  %v452_v38 = vadd.f32 %v2468_v34, %v424_v0  ;;  %1892 = vmatpush3.msra.mxu0 %v2555_v37  ;;  %1962 = vmatpush3.msra.mxu1 %v2555_v37 }
 0x110   : > { %v423_v16 = vadd.f32 %v2474_v39, %v379_v63  ;;  %v448_v39 = vadd.f32 %v2464_v31, %v420_v22  ;;  %v492_v50 = vadd.f32 %v479_v43, %v453_v45  ;;  %v542_v59 = vadd.f32 %v523_v2, %v488_v57  ;;  %1893 = vmatprep.subr.mxu0 %v2172_v4 }
 0x111   : > { %v422_v41 = vadd.f32 %v412_v48, %v378_v1  ;;  %v478_v60 = vsel %vm433_vm1, %v472_v27, %v477_v42  ;;  %v473_v52 = vsel %vm433_vm1, %v471_v21, %v472_v27  ;;  %v491_v23 = vadd.f32 %v477_v42, %v452_v38  ;;  %1963 = vmatprep.subr.mxu1 %v2172_v4 }
 0x112   : > { %v451_v26 = vadd.f32 %v2466_v32, %v423_v16  ;;  %v487_v58 = vadd.f32 %v473_v52, %v448_v39  ;;  %v2561_v39 = vld [vmem:[%s3264_s4] sm:$0xff] }
 0x113   : > { %v521_v6 = vpop.permute.xlu1 %520  ;;  %v527_v29 = vpop.permute.xlu0 %526  ;;  %v450_v44 = vadd.f32 %v2466_v32, %v422_v41  ;;  %1894 = vmatpush3.msra.mxu0 %v2561_v39  ;;  %1964 = vmatpush3.msra.mxu1 %v2561_v39 }
 0x114   : > { %v490_v47 = vadd.f32 %v480_v49, %v451_v26  ;;  %v532_v53 = vsel %vm344_vm2, %v521_v6, %v523_v2  ;;  %1898 = vmatprep.subr.mxu0 %v2172_v4  ;;  %2003 = vmatprep.subr.mxu1 %v2172_v4 }
 0x115   : > { %v489_v55 = vadd.f32 %v478_v60, %v450_v44  ;;  %v541_v61 = vadd.f32 %v532_v53, %v487_v58 }
 0x116   : > { %v544_v62 = vadd.f32 %v527_v29, %v490_v47 }
 0x117   : > { %v525_v32 = vpop.permute.xlu1 %524  ;;  %v531_v56 = vpop.permute.xlu0 %530 }
 0x118   : > { %v533_v31 = vsel %vm344_vm2, %v525_v32, %v527_v29  ;;  %v534_v54 = vsel %vm344_vm2, %v529_v33, %v531_v56  ;;  %v546_v63 = vadd.f32 %v531_v56, %v492_v50 }
 0x119   : > { %v543_v34 = vadd.f32 %v533_v31, %v489_v55  ;;  %v545_v51 = vadd.f32 %v534_v54, %v491_v23 }
 0x11b   : > { %v550_v30 = vpop.permute.xlu1 %549 }
 0x11c   : > { %v2526_v25 = vadd.f32 %v550_v30, %v541_v61  ;;  %v2528_v28 = vadd.f32 %v550_v30, %v542_v59  ;;  %v2530_v0 = vadd.f32 %v550_v30, %v543_v34  ;;  %v2532_v1 = vadd.f32 %v550_v30, %v544_v62 }
 0x11d   : > { %v2534_v36 = vadd.f32 %v550_v30, %v545_v51  ;;  %v2536_v48 = vadd.f32 %v550_v30, %v546_v63  ;;  %v676_v34 = vlaneseq }
 0x11e   : > { %v564_v33 = vrot.slane %v2526_v25, 1  ;;  %v565_v2 = vrot.slane %v2530_v0, 1  ;;  %v567_v7 = vrot.slane %v2528_v28, 1  ;;  %v568_v22 = vrot.slane %v2532_v1, 1 }
 0x11f   : > { %v570_v16 = vrot.slane %v2534_v36, 1  ;;  %v572_v40 = vrot.slane %v2536_v48, 1  ;;  %v2609_v50 = vshrl.u32 %v676_v34, 7 }
 0x120   : > { %v566_v41 = vsel %vm433_vm1, %v564_v33, %v565_v2  ;;  %v569_v35 = vsel %vm433_vm1, %v567_v7, %v568_v22 }
 0x121   : > { %v571_v43 = vsel %vm433_vm1, %v565_v2, %v570_v16  ;;  %v573_v24 = vsel %vm433_vm1, %v568_v22, %v572_v40  ;;  %v579_v27 = vsel %vm578_vm3, %v566_v41, 0.0  ;;  %v589_v26 = vsel %vm588_vm4, %v569_v35, 0.0 }
 0x122   : > { %v580_v42 = vsel %vm578_vm3, %v571_v43, 0.0  ;;  %v590_v21 = vsel %vm588_vm4, %v573_v24, 0.0  ;;  %v2612_v51 = vsub.s32 0, %v2609_v50 }
 0x123   : > { %v581_v6 = vadd.f32 %v580_v42, %v579_v27  ;;  %v591_v29 = vadd.f32 %v590_v21, %v589_v26 }
 0x125   : > { %v582_v44 = vrot.slane %v581_v6, 4  ;;  %v592_v38 = vrot.slane %v591_v29, 4 }
 0x127   : > { %v583_v49 = vadd.f32 %v582_v44, %v581_v6  ;;  %v593_v45 = vadd.f32 %v592_v38, %v591_v29 }
 0x129   : > { %v584_v46 = vrot.slane %v583_v49, 2  ;;  %v594_v47 = vrot.slane %v593_v45, 2 }
 0x12b   : > { %v585_v60 = vadd.f32 %v584_v46, %v583_v49  ;;  %v595_v52 = vadd.f32 %v594_v47, %v593_v45 }
 0x12d   : > { %v586_v53 = vrot.slane %v585_v60, 1  ;;  %v596_v32 = vrot.slane %v595_v52, 1 }
 0x12f   : > { %v587_v55 = vadd.f32 %v586_v53, %v585_v60  ;;  %v597_v23 = vadd.f32 %v596_v32, %v595_v52 }
 0x131   : > { %v2087_v56 = vpack.i.bf16 %v597_v23, %v587_v55 }
 0x133   : > { %2088 = vrot.lane.b32.xlu0 %v2087_v56, %s2171_s21 }
 0x1a5   : > { %v2089_v57 = vpop.permute.xlu0 %2088 }
 0x1a6   : > { %v2091_v58 = vunpack.i.h.bf16 %v2089_v57  ;;  %v2090_v31 = vunpack.i.l.bf16 %v2089_v57 }
 0x1a8   : > { %v604_v54 = vsel %vm344_vm2, %v2090_v31, %v2091_v58 }
 0x1a9   : > { %1896 = vmatmul.mubr.f32.vlgmr.msra.gmra.mxu0 %v604_v54 }
 0x1aa   : > { %1899 = vmatpush3.msra.mxu0 %v2335_v3  ;;  %1930 = vmatprep.mubr.msk.f32.mxu0 %vm2173_vm5, %v2172_v4 }
 0x1ab   : > { %1900 = vmatprep.subr.mxu0 %v2172_v4 }
 0x1ac   : > { %1901 = vmatpush3.msra.mxu0 %v2341_v5 }
 0x1ad   : > { %1902 = vmatprep.subr.mxu0 %v2172_v4 }
 0x1ae   : > { %1903 = vmatpush3.msra.mxu0 %v2350_v8 }
 0x1af   : > { %1904 = vmatprep.subr.mxu0 %v2172_v4 }
 0x1b0   : > { %1905 = vmatpush3.msra.mxu0 %v2359_v9 }
 0x1b1   : > { %1906 = vmatprep.subr.mxu0 %v2172_v4 }
 0x1b2   : > { %1907 = vmatpush3.msra.mxu0 %v2368_v10 }
 0x1b3   : > { %1908 = vmatprep.subr.mxu0 %v2172_v4 }
 0x1b4   : > { %1909 = vmatpush3.msra.mxu0 %v2377_v11 }
 0x1b5   : > { %1910 = vmatprep.subr.mxu0 %v2172_v4 }
 0x1b6   : > { %1911 = vmatpush3.msra.mxu0 %v2386_v12 }
 0x1b7   : > { %1912 = vmatprep.subr.mxu0 %v2172_v4 }
 0x1b8   : > { %1913 = vmatpush3.msra.mxu0 %v2395_v13 }
 0x1b9   : > { %1914 = vmatprep.subr.mxu0 %v2172_v4 }
 0x1ba   : > { %1915 = vmatpush3.msra.mxu0 %v2404_v14 }
 0x1bb   : > { %1916 = vmatprep.subr.mxu0 %v2172_v4 }
 0x1bc   : > { %1917 = vmatpush3.msra.mxu0 %v2413_v15 }
 0x1bd   : > { %1918 = vmatprep.subr.mxu0 %v2172_v4 }
 0x1be   : > { %1919 = vmatpush3.msra.mxu0 %v2422_v17 }
 0x1bf   : > { %1920 = vmatprep.subr.mxu0 %v2172_v4 }
 0x1c0   : > { %1921 = vmatpush3.msra.mxu0 %v2431_v18 }
 0x1c1   : > { %1922 = vmatprep.subr.mxu0 %v2172_v4 }
 0x1c2   : > { %1923 = vmatpush3.msra.mxu0 %v2440_v19 }
 0x1c3   : > { %1924 = vmatprep.subr.mxu0 %v2172_v4 }
 0x1c4   : > { %1925 = vmatpush3.msra.mxu0 %v2449_v20 }
 0x1c5   : > { %1926 = vmatprep.subr.mxu0 %v2172_v4 }
 0x1c6   : > { %1927 = vmatpush3.msra.mxu0 %v2555_v37 }
 0x1c7   : > { %1928 = vmatprep.subr.mxu0 %v2172_v4 }
 0x1c8   : > { %1929 = vmatpush3.msra.mxu0 %v2561_v39 }
 0x269   : > { %v672_v59 = vpop.f32.mrf.mxu0 }
 0x26a   : > { %v679_v61 = vrot.slane %v672_v59, %v2612_v51 }
 0x26b   : > { %v1897_v62 = vpop.f32.mrf.mxu0 }
 0x26c   : > { %681 = vrot.lane.b32.xlu1 %v679_v61, %s2170_s30 }
 0x2de   : > { %v682_v63 = vpop.permute.xlu1 %681 }
 0x2df   : > { %v2617_v30 = vsub.f32 %v2526_v25, %v682_v63  ;;  %v2620_v33 = vsub.f32 %v2528_v28, %v682_v63  ;;  %v2623_v2 = vsub.f32 %v2530_v0, %v682_v63  ;;  %v2626_v7 = vsub.f32 %v2532_v1, %v682_v63 }
 0x2e0   : > { %v2629_v22 = vsub.f32 %v2534_v36, %v682_v63  ;;  %v2632_v16 = vsub.f32 %v2536_v48, %v682_v63 }
 0x2e1   : > { %v690_v40 = vmul.f32 %v2617_v30, %v2617_v30  ;;  %v691_v25 = vmul.f32 %v2620_v33, %v2620_v33  ;;  %v692_v28 = vmul.f32 %v2623_v2, %v2623_v2  ;;  %v693_v0 = vmul.f32 %v2626_v7, %v2626_v7 }
 0x2e2   : > { %v694_v1 = vmul.f32 %v2629_v22, %v2629_v22  ;;  %v695_v36 = vmul.f32 %v2632_v16, %v2632_v16 }
 0x2e3   : > { %v702_v48 = vrot.slane %v690_v40, 1  ;;  %v703_v41 = vrot.slane %v692_v28, 1  ;;  %v705_v35 = vrot.slane %v691_v25, 1  ;;  %v706_v43 = vrot.slane %v693_v0, 1  ;;  %v827_v40 = vld [vmem:[%s3261_s1 + $0x12] ss:$0 sm:$0xff] }
 0x2e4   : > { %v708_v24 = vrot.slane %v694_v1, 1  ;;  %v710_v27 = vrot.slane %v695_v36, 1 }
 0x2e5   : > { %v704_v26 = vsel %vm433_vm1, %v702_v48, %v703_v41  ;;  %v707_v42 = vsel %vm433_vm1, %v705_v35, %v706_v43  ;;  %v880_v48 = vld [vmem:[%s3262_s2 + $0xf8] sm:$0xff]  ;;  %v878_v35 = vld [vmem:[%s3262_s2 + $0xe8] sm:$0xff] }
 0x2e6   : > { %v709_v21 = vsel %vm433_vm1, %v703_v41, %v708_v24  ;;  %v711_v6 = vsel %vm433_vm1, %v706_v43, %v710_v27  ;;  %v716_v29 = vsel %vm578_vm3, %v704_v26, 0.0  ;;  %v725_v44 = vsel %vm588_vm4, %v707_v42, 0.0  ;;  %v879_v41 = vld [vmem:[%s3262_s2 + $0xf0] sm:$0xff]  ;;  %922 = vmatprep.subr.mxu0 %v880_v48  ;;  %v877_v43 = vld [vmem:[%s3262_s2 + $0xe0] sm:$0xff]  ;;  %v876_v27 = vld [vmem:[%s3262_s2 + $0xd8] sm:$0xff] }
 0x2e7   : > { %v717_v38 = vsel %vm578_vm3, %v709_v21, 0.0  ;;  %v726_v49 = vsel %vm588_vm4, %v711_v6, 0.0  ;;  %v838_v24 = vld [vmem:[%s3261_s1 + $0x13] ss:$0 sm:$0xff]  ;;  %v874_v42 = vld [vmem:[%s3262_s2 + $0xc8] sm:$0xff]  ;;  %v873_v21 = vld [vmem:[%s3262_s2 + $0xc0] sm:$0xff] }
 0x2e8   : > { %v718_v45 = vadd.f32 %v717_v38, %v716_v29  ;;  %v727_v46 = vadd.f32 %v726_v49, %v725_v44  ;;  %v875_v26 = vld [vmem:[%s3262_s2 + $0xd0] sm:$0xff]  ;;  %v872_v6 = vld [vmem:[%s3262_s2 + $0xb8] sm:$0xff]  ;;  %v870_v44 = vld [vmem:[%s3262_s2 + $0xa8] sm:$0xff] }
 0x2e9   : > { %v871_v29 = vld [vmem:[%s3262_s2 + $0xb0] sm:$0xff]  ;;  %v869_v38 = vld [vmem:[%s3262_s2 + $0xa0] sm:$0xff]  ;;  %v868_v49 = vld [vmem:[%s3262_s2 + $0x98] sm:$0xff] }
 0x2ea   : > { %v719_v47 = vrot.slane %v718_v45, 4  ;;  %v728_v60 = vrot.slane %v727_v46, 4 }
 0x2ec   : > { %v720_v52 = vadd.f32 %v719_v47, %v718_v45  ;;  %v729_v53 = vadd.f32 %v728_v60, %v727_v46  ;;  %v867_v45 = vld [vmem:[%s3262_s2 + $0x90] sm:$0xff]  ;;  %v866_v46 = vld [vmem:[%s3262_s2 + $0x88] sm:$0xff]  ;;  %v865_v47 = vld [vmem:[%s3262_s2 + $0x80] sm:$0xff] }
 0x2ed   : > { %v864_v60 = vld [vmem:[%s3262_s2 + $0x78] sm:$0xff] }
 0x2ee   : > { %v721_v32 = vrot.slane %v720_v52, 2  ;;  %v730_v55 = vrot.slane %v729_v53, 2 }
 0x2f0   : > { %v722_v23 = vadd.f32 %v721_v32, %v720_v52  ;;  %v731_v56 = vadd.f32 %v730_v55, %v729_v53  ;;  %v863_v52 = vld [vmem:[%s3262_s2 + $0x70] sm:$0xff]  ;;  %v862_v53 = vld [vmem:[%s3262_s2 + $0x68] sm:$0xff]  ;;  %v861_v32 = vld [vmem:[%s3262_s2 + $0x60] sm:$0xff] }
 0x2f1   : > { %v860_v55 = vld [vmem:[%s3262_s2 + $0x58] sm:$0xff] }
 0x2f2   : > { %v723_v57 = vrot.slane %v722_v23, 1  ;;  %v732_v58 = vrot.slane %v731_v56, 1 }
 0x2f4   : > { %v724_v31 = vadd.f32 %v723_v57, %v722_v23  ;;  %v733_v54 = vadd.f32 %v732_v58, %v731_v56  ;;  %v859_v23 = vld [vmem:[%s3262_s2 + $0x50] sm:$0xff]  ;;  %v858_v56 = vld [vmem:[%s3262_s2 + $0x48] sm:$0xff]  ;;  %v857_v57 = vld [vmem:[%s3262_s2 + $0x40] sm:$0xff] }
 0x2f5   : > { %v856_v58 = vld [vmem:[%s3262_s2 + $0x38] sm:$0xff] }
 0x2f6   : > { %v2092_v34 = vpack.i.bf16 %v733_v54, %v724_v31  ;;  %v855_v31 = vld [vmem:[%s3262_s2 + $0x30] sm:$0xff]  ;;  %v854_v54 = vld [vmem:[%s3262_s2 + $0x28] sm:$0xff] }
 0x2f8   : > { %2093 = vrot.lane.b32.xlu0 %v2092_v34, %s2171_s21  ;;  %v853_v34 = vld [vmem:[%s3262_s2 + $0x20] sm:$0xff] }
 0x2fc   : > { %829 = vrot.lane.b32.xlu0 %v827_v40, %s2170_s30  ;;  %v850_v40 = vld [vmem:[%s3262_s2 + $0x8] sm:$0xff] }
 0x36a   : > { %v2094_v59 = vpop.permute.xlu0 %2093 }
 0x36b   : > { %v2096_v61 = vunpack.i.h.bf16 %v2094_v59  ;;  %v2095_v62 = vunpack.i.l.bf16 %v2094_v59  ;;  %v852_v59 = vld [vmem:[%s3262_s2 + $0x18] sm:$0xff] }
 0x36d   : > { %v740_v63 = vsel %vm344_vm2, %v2095_v62, %v2096_v61  ;;  %v851_v61 = vld [vmem:[%s3262_s2 + $0x10] sm:$0xff] }
 0x36e   : > { %1931 = vmatmul.mubr.f32.vlgmr.msra.gmra.mxu0 %v740_v63  ;;  %v830_v63 = vpop.permute.xlu0 %829 }
 0x36f   : > { %986 = vmatprep.mubr.f32.mxu0 %v2172_v4  ;;  %923 = vmatpush1.msra.mxu0 %v879_v41 }
 0x370   : > { %924 = vmatprep.subr.mxu0 %v878_v35 }
 0x371   : > { %925 = vmatpush1.msra.mxu0 %v877_v43 }
 0x372   : > { %926 = vmatprep.subr.mxu0 %v876_v27 }
 0x373   : > { %927 = vmatpush1.msra.mxu0 %v875_v26 }
 0x374   : > { %928 = vmatprep.subr.mxu0 %v874_v42 }
 0x375   : > { %929 = vmatpush1.msra.mxu0 %v873_v21 }
 0x376   : > { %930 = vmatprep.subr.mxu0 %v872_v6 }
 0x377   : > { %931 = vmatpush1.msra.mxu0 %v871_v29 }
 0x378   : > { %932 = vmatprep.subr.mxu0 %v870_v44 }
 0x379   : > { %933 = vmatpush1.msra.mxu0 %v869_v38 }
 0x37a   : > { %934 = vmatprep.subr.mxu0 %v868_v49 }
 0x37b   : > { %935 = vmatpush1.msra.mxu0 %v867_v45 }
 0x37c   : > { %936 = vmatprep.subr.mxu0 %v866_v46 }
 0x37d   : > { %937 = vmatpush1.msra.mxu0 %v865_v47 }
 0x37e   : > { %938 = vmatprep.subr.mxu0 %v864_v60 }
 0x37f   : > { %939 = vmatpush1.msra.mxu0 %v863_v52 }
 0x380   : > { %940 = vmatprep.subr.mxu0 %v862_v53 }
 0x381   : > { %941 = vmatpush1.msra.mxu0 %v861_v32 }
 0x382   : > { %942 = vmatprep.subr.mxu0 %v860_v55  ;;  %v1194_v55 = vld [vmem:[%s3261_s1 + $0x20] ss:$0 sm:$0xff] }
 0x383   : > { %943 = vmatpush1.msra.mxu0 %v859_v23  ;;  %v1205_v23 = vld [vmem:[%s3261_s1 + $0x21] ss:$0 sm:$0xff] }
 0x384   : > { %944 = vmatprep.subr.mxu0 %v858_v56 }
 0x385   : > { %945 = vmatpush1.msra.mxu0 %v857_v57 }
 0x386   : > { %946 = vmatprep.subr.mxu0 %v856_v58 }
 0x387   : > { %947 = vmatpush1.msra.mxu0 %v855_v31 }
 0x388   : > { %948 = vmatprep.subr.mxu0 %v854_v54 }
 0x389   : > { %949 = vmatpush1.msra.mxu0 %v853_v34 }
 0x38a   : > { %950 = vmatprep.subr.mxu0 %v852_v59 }
 0x38b   : > { %951 = vmatpush1.msra.mxu0 %v851_v61 }
 0x38c   : > { %952 = vmatprep.subr.mxu0 %v850_v40  ;;  %v2142_v40 = vld [vmem:[%s2237_s12 + $0x8] sm:$0xff] }
 0x42e   : > { %v808_v25 = vpop.f32.mrf.mxu0 }
 0x42f   : > { %v809_v28 = vadd.f32 1e-05, %v808_v25  ;;  %v849_v25 = vld [vmem:[%s3262_s2] sm:$0xff] }
 0x430   : > { %v1932_v0 = vpop.f32.mrf.mxu0  ;;  %953 = vmatpush1.msra.mxu0 %v849_v25 }
 0x431   : > { %2127 = vrsqrt.f32 %v809_v28  ;;  %1968 = vmatprep.subr.mxu0 %v2172_v4 }
 0x43e   : > { %v2128_v1 = vpop.eup %2127 }
 0x43f   : > { %v816_v36 = vrot.slane %v2128_v1, %v2612_v51 }
 0x441   : > { %818 = vrot.lane.b32.xlu1 %v816_v36, %s2170_s30 }
 0x445   : > { %840 = vrot.lane.b32.xlu1 %v838_v24, %s2170_s30 }
 0x4b3   : > { %v819_v62 = vpop.permute.xlu1 %818 }
 0x4b4   : > { %v821_v28 = vmul.f32 %v819_v62, %v2617_v30  ;;  %v822_v0 = vmul.f32 %v819_v62, %v2620_v33  ;;  %v823_v1 = vmul.f32 %v819_v62, %v2623_v2  ;;  %v824_v36 = vmul.f32 %v819_v62, %v2626_v7 }
 0x4b5   : > { %v825_v48 = vmul.f32 %v819_v62, %v2629_v22  ;;  %v826_v41 = vmul.f32 %v819_v62, %v2632_v16  ;;  %v2141_v62 = vld [vmem:[%s2237_s12] sm:$0xff] }
 0x4b6   : > { %v832_v35 = vmul.f32 %v830_v63, %v821_v28  ;;  %v833_v43 = vmul.f32 %v830_v63, %v822_v0  ;;  %v834_v24 = vmul.f32 %v830_v63, %v823_v1  ;;  %v835_v27 = vmul.f32 %v830_v63, %v824_v36  ;;  %v2143_v28 = vld [vmem:[%s2237_s12 + $0x10] sm:$0xff]  ;;  %v2144_v1 = vld [vmem:[%s2237_s12 + $0x18] sm:$0xff] }
 0x4b7   : > { %v836_v26 = vmul.f32 %v830_v63, %v825_v48  ;;  %v837_v30 = vmul.f32 %v830_v63, %v826_v41  ;;  %v841_v42 = vpop.permute.xlu1 %840 }
 0x4b8   : > { %v845_v33 = vadd.f32 %v841_v42, %v834_v24  ;;  %v846_v21 = vadd.f32 %v841_v42, %v835_v27  ;;  %v843_v2 = vadd.f32 %v841_v42, %v832_v35  ;;  %v844_v6 = vadd.f32 %v841_v42, %v833_v43  ;;  %v2145_v35 = vld [vmem:[%s2237_s12 + $0x20] sm:$0x3]  ;;  %v2146_v24 = vld [vmem:[%s2237_s12 + $0x28] sm:$0x3]  ;;  %s224_s12 = scalar_lea.vmem %s3265_s5, %s1760_s25 }
 0x4b9   : > { %v847_v7 = vadd.f32 %v841_v42, %v836_v26  ;;  %v848_v29 = vadd.f32 %v841_v42, %v837_v30 }
 0x4ba   : > { %v901_v44 = vrot.slane %v845_v33, 1  ;;  %v904_v22 = vrot.slane %v846_v21, 1  ;;  %v900_v38 = vrot.slane %v843_v2, 1  ;;  %v903_v16 = vrot.slane %v844_v6, 1 }
 0x4bb   : > { %v906_v49 = vrot.slane %v847_v7, 1  ;;  %v908_v45 = vrot.slane %v848_v29, 1 }
 0x4bc   : > { %v902_v46 = vsel %vm433_vm1, %v900_v38, %v901_v44  ;;  %v905_v47 = vsel %vm433_vm1, %v903_v16, %v904_v22 }
 0x4bd   : > { %v907_v60 = vsel %vm433_vm1, %v901_v44, %v906_v49  ;;  %v909_v52 = vsel %vm433_vm1, %v904_v22, %v908_v45  ;;  %v2097_v53 = vpack.i.bf16 %v905_v47, %v902_v46 }
 0x4be   : > { %v2102_v32 = vpack.i.bf16 %v909_v52, %v907_v60 }
 0x4bf   : > { %2098 = vrot.lane.b32.xlu0 %v2097_v53, %s2171_s21 }
 0x4c0   : > { %2103 = vrot.lane.b32.xlu1 %v2102_v32, %s2171_s21 }
 0x4c3   : > { %1196 = vrot.lane.b32.xlu0 %v1194_v55, %s2170_s30 }
 0x4c4   : > { %1207 = vrot.lane.b32.xlu1 %v1205_v23, %s2170_s30 }
 0x531   : > { %v2099_v56 = vpop.permute.xlu0 %2098 }
 0x532   : > { %v2104_v57 = vpop.permute.xlu1 %2103  ;;  %v2101_v58 = vunpack.i.h.bf16 %v2099_v56  ;;  %v2100_v31 = vunpack.i.l.bf16 %v2099_v56 }
 0x533   : > { %v2106_v54 = vunpack.i.h.bf16 %v2104_v57  ;;  %v2105_v34 = vunpack.i.l.bf16 %v2104_v57 }
 0x534   : > { %v918_v59 = vsel %vm344_vm2, %v2100_v31, %v2101_v58 }
 0x535   : > { %987 = vmatmul.mubr.f32.vlgmr.msra.gmra.mxu0 %v918_v59  ;;  %v1197_v61 = vpop.permute.xlu0 %1196  ;;  %v919_v41 = vsel %vm344_vm2, %v2105_v34, %v2106_v54 }
 0x536   : > { %992 = vmatprep.mubr.f32.mxu0 %v2172_v4  ;;  %v1199_v63 = vmul.f32 %v2141_v62, %v1197_v61  ;;  %v1200_v25 = vmul.f32 %v2142_v40, %v1197_v61  ;;  %v1201_v0 = vmul.f32 %v2143_v28, %v1197_v61  ;;  %v1202_v36 = vmul.f32 %v2144_v1, %v1197_v61  ;;  %v1208_v48 = vpop.permute.xlu1 %1207 }
 0x537   : > { %v1203_v43 = vmul.f32 %v2145_v35, %v1197_v61  ;;  %v1204_v27 = vmul.f32 %v2146_v24, %v1197_v61  ;;  %1969 = vmatpush3.msra.mxu0 %v2335_v3 }
 0x538   : > { %v2794_v26 = vadd.f32 %v1208_v48, %v1199_v63  ;;  %v2796_v30 = vadd.f32 %v1208_v48, %v1200_v25  ;;  %v2798_v42 = vadd.f32 %v1208_v48, %v1201_v0  ;;  %v2800_v33 = vadd.f32 %v1208_v48, %v1202_v36  ;;  %1970 = vmatprep.subr.mxu0 %v2172_v4 }
 0x539   : > { %993 = vmatmul.mubr.f32.gmra.mxu0 %v919_v41  ;;  %v2803_v21 = vadd.f32 %v1208_v48, %v1203_v43  ;;  %v2805_v2 = vadd.f32 %v1208_v48, %v1204_v27  ;;  %v1013_v41 = vld [vmem:[%s3261_s1 + $0x14] ss:$0 sm:$0xff] }
 0x53a   : > { %v1222_v6 = vrot.slane %v2794_v26, 1  ;;  %v1223_v7 = vrot.slane %v2798_v42, 1  ;;  %v1225_v3 = vrot.slane %v2796_v30, 1  ;;  %v1226_v29 = vrot.slane %v2800_v33, 1  ;;  %1971 = vmatpush3.msra.mxu0 %v2341_v5  ;;  %2000 = vmatprep.mubr.msk.f32.mxu0 %vm2173_vm5, %v2172_v4 }
 0x53b   : > { %v1228_v44 = vrot.slane %v2803_v21, 1  ;;  %v1230_v22 = vrot.slane %v2805_v2, 1  ;;  %1972 = vmatprep.subr.mxu0 %v2172_v4 }
 0x53c   : > { %v1224_v38 = vsel %vm433_vm1, %v1222_v6, %v1223_v7  ;;  %v1227_v16 = vsel %vm433_vm1, %v1225_v3, %v1226_v29  ;;  %1973 = vmatpush3.msra.mxu0 %v2350_v8  ;;  %v1016_v6 = vld [vmem:[%s3261_s1 + $0x15] ss:$0 sm:$0xff] }
 0x53d   : > { %v1229_v49 = vsel %vm433_vm1, %v1223_v7, %v1228_v44  ;;  %v1231_v45 = vsel %vm433_vm1, %v1226_v29, %v1230_v22  ;;  %v1236_v5 = vsel %vm578_vm3, %v1224_v38, 0.0  ;;  %v1245_v46 = vsel %vm588_vm4, %v1227_v16, 0.0  ;;  %1974 = vmatprep.subr.mxu0 %v2172_v4 }
 0x53e   : > { %v1237_v47 = vsel %vm578_vm3, %v1229_v49, 0.0  ;;  %v1246_v60 = vsel %vm588_vm4, %v1231_v45, 0.0  ;;  %1975 = vmatpush3.msra.mxu0 %v2359_v9 }
 0x53f   : > { %v1238_v52 = vadd.f32 %v1237_v47, %v1236_v5  ;;  %v1247_v53 = vadd.f32 %v1246_v60, %v1245_v46  ;;  %1976 = vmatprep.subr.mxu0 %v2172_v4  ;;  %v2876_v46 = vld [vmem:[%s3264_s4 + $0x78] sm:$0xff]  ;;  %v2885_v47 = vld [vmem:[%s3264_s4 + $0x70] sm:$0xff]  ;;  %v2892_v60 = vld [vmem:[%s3264_s4 + $0x68] sm:$0xff] }
 0x540   : > { %1977 = vmatpush3.msra.mxu0 %v2368_v10 }
 0x541   : > { %v1239_v8 = vrot.slane %v1238_v52, 4  ;;  %v1248_v32 = vrot.slane %v1247_v53, 4  ;;  %1978 = vmatprep.subr.mxu0 %v2172_v4 }
 0x542   : > { %1979 = vmatpush3.msra.mxu0 %v2377_v11 }
 0x543   : > { %v1240_v55 = vadd.f32 %v1239_v8, %v1238_v52  ;;  %v1249_v23 = vadd.f32 %v1248_v32, %v1247_v53  ;;  %1980 = vmatprep.subr.mxu0 %v2172_v4  ;;  %v2150_v52 = vld [vmem:[%s3264_s4 + $0x60] sm:$0xff]  ;;  %v2151_v53 = vld [vmem:[%s3264_s4 + $0x58] sm:$0xff]  ;;  %v2152_v8 = vld [vmem:[%s3264_s4 + $0x50] sm:$0xff] }
 0x544   : > { %1981 = vmatpush3.msra.mxu0 %v2386_v12  ;;  %v2153_v32 = vld [vmem:[%s3264_s4 + $0x48] sm:$0xff] }
 0x545   : > { %v1241_v56 = vrot.slane %v1240_v55, 2  ;;  %v1250_v9 = vrot.slane %v1249_v23, 2  ;;  %1982 = vmatprep.subr.mxu0 %v2172_v4 }
 0x546   : > { %1983 = vmatpush3.msra.mxu0 %v2395_v13  ;;  %v890_v13 = vsub.s32 1, %v2609_v50 }
 0x547   : > { %v1242_v57 = vadd.f32 %v1241_v56, %v1240_v55  ;;  %v1251_v10 = vadd.f32 %v1250_v9, %v1249_v23  ;;  %1984 = vmatprep.subr.mxu0 %v2172_v4  ;;  %v2154_v55 = vld [vmem:[%s3264_s4 + $0x40] sm:$0xff]  ;;  %v2155_v23 = vld [vmem:[%s3264_s4 + $0x38] sm:$0xff]  ;;  %v2156_v56 = vld [vmem:[%s3264_s4 + $0x30] sm:$0xff] }
 0x548   : > { %1985 = vmatpush3.msra.mxu0 %v2404_v14  ;;  %v1754_v14 = vld [vmem:[%s3261_s1 + $0x24] ss:$8 sm:$0x3] }
 0x549   : > { %v1243_v58 = vrot.slane %v1242_v57, 1  ;;  %v1252_v11 = vrot.slane %v1251_v10, 1  ;;  %1986 = vmatprep.subr.mxu0 %v2172_v4  ;;  %v887_v0 = vrot.slane %v1754_v14, %v2612_v51  ;;  %v2157_v9 = vld [vmem:[%s3264_s4 + $0x28] sm:$0xff] }
 0x54a   : > { %1987 = vmatpush3.msra.mxu0 %v2413_v15  ;;  %v891_v15 = vrot.slane %v1754_v14, %v890_v13 }
 0x54b   : > { %v1244_v31 = vadd.f32 %v1243_v58, %v1242_v57  ;;  %v1253_v12 = vadd.f32 %v1252_v11, %v1251_v10  ;;  %1988 = vmatprep.subr.mxu0 %v2172_v4  ;;  %v2158_v57 = vld [vmem:[%s3264_s4 + $0x20] sm:$0xff]  ;;  %v2159_v58 = vld [vmem:[%s3264_s4 + $0x18] sm:$0xff] }
 0x54c   : > { %1989 = vmatpush3.msra.mxu0 %v2422_v17 }
 0x54d   : > { %v2107_v54 = vpack.i.bf16 %v1253_v12, %v1244_v31  ;;  %1990 = vmatprep.subr.mxu0 %v2172_v4  ;;  %v2160_v12 = vld [vmem:[%s3264_s4 + $0x10] sm:$0xff] }
 0x54e   : > { %1991 = vmatpush3.msra.mxu0 %v2431_v18 }
 0x54f   : > { %2108 = vrot.lane.b32.xlu0 %v2107_v54, %s2171_s21  ;;  %1992 = vmatprep.subr.mxu0 %v2172_v4 }
 0x550   : > { %1993 = vmatpush3.msra.mxu0 %v2440_v19 }
 0x551   : > { %1994 = vmatprep.subr.mxu0 %v2172_v4 }
 0x552   : > { %1995 = vmatpush3.msra.mxu0 %v2449_v20 }
 0x553   : > { %1996 = vmatprep.subr.mxu0 %v2172_v4 }
 0x554   : > { %1997 = vmatpush3.msra.mxu0 %v2555_v37 }
 0x555   : > { %1998 = vmatprep.subr.mxu0 %v2172_v4 }
 0x556   : > { %1999 = vmatpush3.msra.mxu0 %v2561_v39 }
 0x557   : > { %2038 = vmatprep.subr.mxu0 %v2172_v4 }
 0x5c1   : > { %v2109_v10 = vpop.permute.xlu0 %2108 }
 0x5c2   : > { %v2111_v11 = vunpack.i.h.bf16 %v2109_v10  ;;  %v2110_v31 = vunpack.i.l.bf16 %v2109_v10 }
 0x5c4   : > { %v1260_v54 = vsel %vm344_vm2, %v2110_v31, %v2111_v11 }
 0x5f5   : > { %v988_v17 = vpop.f32.mrf.mxu0 }
 0x5f6   : > { %v989_v1 = vadd.f32 %v988_v17, %v887_v0 }
 0x5f7   : > { %v990_v18 = vpop.f32.mrf.mxu0 }
 0x5f8   : > { %v991_v19 = vadd.f32 %v990_v18, %v891_v15 }
 0x5f9   : > { %v994_v20 = vpop.f32.mrf.mxu0 }
 0x5fa   : > { %v1755_v34 = vmul.f32 -1.442695, %v991_v19  ;;  %v995_v35 = vadd.f32 %v994_v20, %v887_v0 }
 0x5fb   : > { %v996_v59 = vpop.f32.mrf.mxu0 }
 0x5fc   : > { %2129 = vpow2.f32 %v1755_v34  ;;  %v997_v61 = vadd.f32 %v996_v59, %v891_v15 }
 0x5fe   : > { %v1756_v62 = vmul.f32 -1.442695, %v997_v61 }
 0x600   : > { %2131 = vpow2.f32 %v1756_v62 }
 0x609   : > { %v2130_v63 = vpop.eup %2129 }
 0x60a   : > { %v1005_v40 = vadd.f32 1.0, %v2130_v63 }
 0x60c   : > { %2133 = vrcp.f32 %v1005_v40 }
 0x60d   : > { %v2132_v25 = vpop.eup %2131 }
 0x60e   : > { %v1006_v28 = vadd.f32 1.0, %v2132_v25 }
 0x610   : > { %2135 = vrcp.f32 %v1006_v28 }
 0x619   : > { %v2134_v36 = vpop.eup %2133 }
 0x61a   : > { %v1011_v48 = vmul.f32 %v2134_v36, %v989_v1 }
 0x61c   : > { %v1014_v27 = vmul.f32 %v1013_v41, %v1011_v48 }
 0x61d   : > { %v2136_v43 = vpop.eup %2135 }
 0x61e   : > { %v1012_v24 = vmul.f32 %v2136_v43, %v995_v35  ;;  %v2867_v3 = vadd.f32 %v1016_v6, %v1014_v27 }
 0x620   : > { %v1015_v7 = vmul.f32 %v1013_v41, %v1012_v24 }
 0x622   : > { %v2869_v29 = vadd.f32 %v1016_v6, %v1015_v7 }
 0x624   : > { %v1019_v44 = vadd.f32 %v2869_v29, %v2867_v3 }
 0x626   : > { %v1020_v22 = vrot.slane %v1019_v44, 4 }
 0x628   : > { %v1021_v38 = vadd.f32 %v1020_v22, %v1019_v44 }
 0x62a   : > { %v1022_v16 = vrot.slane %v1021_v38, 2 }
 0x62c   : > { %v1023_v49 = vadd.f32 %v1022_v16, %v1021_v38 }
 0x62e   : > { %v1024_v45 = vrot.slane %v1023_v49, 1 }
 0x630   : > { %v1025_v5 = vadd.f32 %v1024_v45, %v1023_v49 }
 0x632   : > { %1966 = vmatmul.mubr.f32.vlgmr.msra.gmra.mxu1 %v1025_v5 }
 0x633   : > { %2004 = vmatpush3.msra.mxu1 %v2876_v46  ;;  %2035 = vmatprep.mubr.msk.f32.mxu1 %vm2173_vm5, %v2172_v4 }
 0x634   : > { %2005 = vmatprep.subr.mxu1 %v2172_v4 }
 0x635   : > { %2006 = vmatpush3.msra.mxu1 %v2885_v47 }
 0x636   : > { %2007 = vmatprep.subr.mxu1 %v2172_v4 }
 0x637   : > { %2008 = vmatpush3.msra.mxu1 %v2892_v60 }
 0x638   : > { %2009 = vmatprep.subr.mxu1 %v2172_v4 }
 0x639   : > { %2010 = vmatpush3.msra.mxu1 %v2150_v52 }
 0x63a   : > { %2011 = vmatprep.subr.mxu1 %v2172_v4 }
 0x63b   : > { %2012 = vmatpush3.msra.mxu1 %v2151_v53 }
 0x63c   : > { %2013 = vmatprep.subr.mxu1 %v2172_v4 }
 0x63d   : > { %2014 = vmatpush3.msra.mxu1 %v2152_v8 }
 0x63e   : > { %2015 = vmatprep.subr.mxu1 %v2172_v4 }
 0x63f   : > { %2016 = vmatpush3.msra.mxu1 %v2153_v32 }
 0x640   : > { %2017 = vmatprep.subr.mxu1 %v2172_v4 }
 0x641   : > { %2018 = vmatpush3.msra.mxu1 %v2154_v55 }
 0x642   : > { %2019 = vmatprep.subr.mxu1 %v2172_v4 }
 0x643   : > { %2020 = vmatpush3.msra.mxu1 %v2155_v23 }
 0x644   : > { %2021 = vmatprep.subr.mxu1 %v2172_v4 }
 0x645   : > { %2022 = vmatpush3.msra.mxu1 %v2156_v56 }
 0x646   : > { %2023 = vmatprep.subr.mxu1 %v2172_v4 }
 0x647   : > { %2024 = vmatpush3.msra.mxu1 %v2157_v9 }
 0x648   : > { %2025 = vmatprep.subr.mxu1 %v2172_v4 }
 0x649   : > { %2026 = vmatpush3.msra.mxu1 %v2158_v57 }
 0x64a   : > { %2027 = vmatprep.subr.mxu1 %v2172_v4 }
 0x64b   : > { %2028 = vmatpush3.msra.mxu1 %v2159_v58 }
 0x64c   : > { %2029 = vmatprep.subr.mxu1 %v2172_v4 }
 0x64d   : > { %2030 = vmatpush3.msra.mxu1 %v2160_v12 }
 0x64e   : > { %2031 = vmatprep.subr.mxu1 %v2172_v4 }
 0x64f   : > { %2032 = vmatpush3.msra.mxu1 %v2555_v37 }
 0x650   : > { %2033 = vmatprep.subr.mxu1 %v2172_v4 }
 0x651   : > { %2034 = vmatpush3.msra.mxu1 %v2561_v39 }
 0x652   : > { %2036 = vmatmul.mubr.f32.vlgmr.msra.gmra.mxu1 %v1260_v54 }
 0x6f2   : > { %v1092_v14 = vpop.f32.mrf.mxu1 }
 0x6f3   : > { %v1099_v15 = vrot.slane %v1092_v14, %v2612_v51 }
 0x6f4   : > { %v1967_v17 = vpop.f32.mrf.mxu1 }
 0x6f5   : > { %v2946_v18 = vsub.f32 %v2867_v3, %v1099_v15  ;;  %v2949_v19 = vsub.f32 %v2869_v29, %v1099_v15 }
 0x6f7   : > { %v1102_v20 = vmul.f32 %v2946_v18, %v2946_v18  ;;  %v1103_v34 = vmul.f32 %v2949_v19, %v2949_v19 }
 0x6f9   : > { %v1104_v59 = vadd.f32 %v1103_v34, %v1102_v20  ;;  %v1483_v34 = vld [vmem:[%s3261_s1 + $0x22] ss:$0 sm:$0xff] }
 0x6fb   : > { %v1105_v61 = vrot.slane %v1104_v59, 4 }
 0x6fd   : > { %v1106_v62 = vadd.f32 %v1105_v61, %v1104_v59 }
 0x6ff   : > { %v1107_v63 = vrot.slane %v1106_v62, 2 }
 0x701   : > { %v1108_v40 = vadd.f32 %v1107_v63, %v1106_v62 }
 0x703   : > { %v1109_v25 = vrot.slane %v1108_v40, 1 }
 0x705   : > { %v1110_v28 = vadd.f32 %v1109_v25, %v1108_v40  ;;  %v1564_v25 = vld [vmem:[%s3263_s3 + $0xf8] sm:$0xff] }
 0x706   : > { %1610 = vmatprep.subr.mxu1 %v1564_v25  ;;  %v1577_v25 = vld [vmem:[%s3263_s3 + $0x160] sm:$0xff] }
 0x707   : > { %2001 = vmatmul.mubr.f32.vlgmr.msra.gmra.mxu0 %v1110_v28  ;;  %v1563_v28 = vld [vmem:[%s3263_s3 + $0xf0] sm:$0xff] }
 0x708   : > { %2039 = vmatpush3.msra.mxu0 %v2876_v46  ;;  %2070 = vmatprep.mubr.msk.f32.mxu0 %vm2173_vm5, %v2172_v4 }
 0x709   : > { %2040 = vmatprep.subr.mxu0 %v2172_v4  ;;  %1611 = vmatpush1.msra.mxu1 %v1563_v28  ;;  %v1576_v28 = vld [vmem:[%s3263_s3 + $0x158] sm:$0xff] }
 0x70a   : > { %2041 = vmatpush3.msra.mxu0 %v2885_v47 }
 0x70b   : > { %2042 = vmatprep.subr.mxu0 %v2172_v4 }
 0x70c   : > { %2043 = vmatpush3.msra.mxu0 %v2892_v60 }
 0x70d   : > { %2044 = vmatprep.subr.mxu0 %v2172_v4 }
 0x70e   : > { %2045 = vmatpush3.msra.mxu0 %v2150_v52 }
 0x70f   : > { %2046 = vmatprep.subr.mxu0 %v2172_v4 }
 0x710   : > { %2047 = vmatpush3.msra.mxu0 %v2151_v53 }
 0x711   : > { %2048 = vmatprep.subr.mxu0 %v2172_v4 }
 0x712   : > { %v1328_v0 = vpop.f32.mrf.mxu1  ;;  %2049 = vmatpush3.msra.mxu0 %v2152_v8 }
 0x713   : > { %v1335_v1 = vrot.slane %v1328_v0, %v2612_v51  ;;  %2050 = vmatprep.subr.mxu0 %v2172_v4  ;;  %v1562_v0 = vld [vmem:[%s3263_s3 + $0xe8] sm:$0xff] }
 0x714   : > { %v2037_v36 = vpop.f32.mrf.mxu1  ;;  %2051 = vmatpush3.msra.mxu0 %v2153_v32  ;;  %1612 = vmatprep.subr.mxu1 %v1562_v0  ;;  %v1575_v0 = vld [vmem:[%s3263_s3 + $0x150] sm:$0xff] }
 0x715   : > { %1337 = vrot.lane.b32.xlu1 %v1335_v1, %s2170_s30  ;;  %2052 = vmatprep.subr.mxu0 %v2172_v4  ;;  %v1561_v1 = vld [vmem:[%s3263_s3 + $0xe0] sm:$0xff] }
 0x716   : > { %2053 = vmatpush3.msra.mxu0 %v2154_v55  ;;  %v1494_v36 = vld [vmem:[%s3261_s1 + $0x23] ss:$0 sm:$0xff]  ;;  %1613 = vmatpush1.msra.mxu1 %v1561_v1  ;;  %v1574_v1 = vld [vmem:[%s3263_s3 + $0x148] sm:$0xff] }
 0x717   : > { %2054 = vmatprep.subr.mxu0 %v2172_v4 }
 0x718   : > { %2055 = vmatpush3.msra.mxu0 %v2155_v23 }
 0x719   : > { %2056 = vmatprep.subr.mxu0 %v2172_v4 }
 0x71a   : > { %2057 = vmatpush3.msra.mxu0 %v2156_v56 }
 0x71b   : > { %2058 = vmatprep.subr.mxu0 %v2172_v4 }
 0x71c   : > { %2059 = vmatpush3.msra.mxu0 %v2157_v9 }
 0x71d   : > { %2060 = vmatprep.subr.mxu0 %v2172_v4 }
 0x71e   : > { %2061 = vmatpush3.msra.mxu0 %v2158_v57 }
 0x71f   : > { %2062 = vmatprep.subr.mxu0 %v2172_v4 }
 0x720   : > { %2063 = vmatpush3.msra.mxu0 %v2159_v58 }
 0x721   : > { %2064 = vmatprep.subr.mxu0 %v2172_v4 }
 0x722   : > { %2065 = vmatpush3.msra.mxu0 %v2160_v12 }
 0x723   : > { %2066 = vmatprep.subr.mxu0 %v2172_v4 }
 0x724   : > { %2067 = vmatpush3.msra.mxu0 %v2555_v37 }
 0x725   : > { %2068 = vmatprep.subr.mxu0 %v2172_v4 }
 0x726   : > { %2069 = vmatpush3.msra.mxu0 %v2561_v39 }
 0x787   : > { %v1338_v48 = vpop.permute.xlu1 %1337 }
 0x788   : > { %v2980_v41 = vsub.f32 %v2794_v26, %v1338_v48  ;;  %v2983_v35 = vsub.f32 %v2796_v30, %v1338_v48  ;;  %v2986_v43 = vsub.f32 %v2798_v42, %v1338_v48  ;;  %v2989_v24 = vsub.f32 %v2800_v33, %v1338_v48 }
 0x789   : > { %v2992_v27 = vsub.f32 %v2803_v21, %v1338_v48  ;;  %v2995_v4 = vsub.f32 %v2805_v2, %v1338_v48  ;;  %v1560_v48 = vld [vmem:[%s3263_s3 + $0xd8] sm:$0xff] }
 0x78a   : > { %v1346_v37 = vmul.f32 %v2980_v41, %v2980_v41  ;;  %v1347_v39 = vmul.f32 %v2983_v35, %v2983_v35  ;;  %v1348_v26 = vmul.f32 %v2986_v43, %v2986_v43  ;;  %v1349_v30 = vmul.f32 %v2989_v24, %v2989_v24  ;;  %1614 = vmatprep.subr.mxu1 %v1560_v48  ;;  %v1572_v48 = vld [vmem:[%s3263_s3 + $0x138] sm:$0xff] }
 0x78b   : > { %v1350_v42 = vmul.f32 %v2992_v27, %v2992_v27  ;;  %v1351_v33 = vmul.f32 %v2995_v4, %v2995_v4 }
 0x78c   : > { %v1358_v21 = vrot.slane %v1346_v37, 1  ;;  %v1359_v2 = vrot.slane %v1348_v26, 1  ;;  %v1361_v6 = vrot.slane %v1347_v39, 1  ;;  %v1362_v7 = vrot.slane %v1349_v30, 1  ;;  %v1559_v37 = vld [vmem:[%s3263_s3 + $0xd0] sm:$0xff]  ;;  %v1558_v39 = vld [vmem:[%s3263_s3 + $0xc8] sm:$0xff] }
 0x78d   : > { %v1364_v3 = vrot.slane %v1350_v42, 1  ;;  %v1366_v29 = vrot.slane %v1351_v33, 1  ;;  %v1557_v26 = vld [vmem:[%s3263_s3 + $0xc0] sm:$0xff]  ;;  %1615 = vmatpush1.msra.mxu1 %v1559_v37  ;;  %v1556_v30 = vld [vmem:[%s3263_s3 + $0xb8] sm:$0xff]  ;;  %v1555_v42 = vld [vmem:[%s3263_s3 + $0xb0] sm:$0xff] }
 0x78e   : > { %v1360_v44 = vsel %vm433_vm1, %v1358_v21, %v1359_v2  ;;  %v1363_v22 = vsel %vm433_vm1, %v1361_v6, %v1362_v7  ;;  %1616 = vmatprep.subr.mxu1 %v1558_v39  ;;  %v1554_v33 = vld [vmem:[%s3263_s3 + $0xa8] sm:$0xff]  ;;  %v1553_v21 = vld [vmem:[%s3263_s3 + $0xa0] sm:$0xff]  ;;  %v1551_v6 = vld [vmem:[%s3263_s3 + $0x90] sm:$0xff] }
 0x78f   : > { %v1365_v38 = vsel %vm433_vm1, %v1359_v2, %v1364_v3  ;;  %v1367_v16 = vsel %vm433_vm1, %v1362_v7, %v1366_v29  ;;  %v1372_v49 = vsel %vm578_vm3, %v1360_v44, 0.0  ;;  %v1381_v45 = vsel %vm588_vm4, %v1363_v22, 0.0  ;;  %1617 = vmatpush1.msra.mxu1 %v1557_v26  ;;  %v1552_v2 = vld [vmem:[%s3263_s3 + $0x98] sm:$0xff]  ;;  %v1550_v7 = vld [vmem:[%s3263_s3 + $0x88] sm:$0xff]  ;;  %v1549_v3 = vld [vmem:[%s3263_s3 + $0x80] sm:$0xff] }
 0x790   : > { %v1373_v5 = vsel %vm578_vm3, %v1365_v38, 0.0  ;;  %v1382_v46 = vsel %vm588_vm4, %v1367_v16, 0.0  ;;  %1618 = vmatprep.subr.mxu1 %v1556_v30  ;;  %v1548_v29 = vld [vmem:[%s3263_s3 + $0x78] sm:$0xff]  ;;  %v1547_v44 = vld [vmem:[%s3263_s3 + $0x70] sm:$0xff]  ;;  %v1546_v22 = vld [vmem:[%s3263_s3 + $0x68] sm:$0xff] }
 0x791   : > { %v1374_v47 = vadd.f32 %v1373_v5, %v1372_v49  ;;  %v1383_v60 = vadd.f32 %v1382_v46, %v1381_v45  ;;  %1619 = vmatpush1.msra.mxu1 %v1555_v42  ;;  %v1545_v38 = vld [vmem:[%s3263_s3 + $0x60] sm:$0xff]  ;;  %v1544_v16 = vld [vmem:[%s3263_s3 + $0x58] sm:$0xff]  ;;  %v1543_v49 = vld [vmem:[%s3263_s3 + $0x50] sm:$0xff] }
 0x792   : > { %1620 = vmatprep.subr.mxu1 %v1554_v33  ;;  %v1542_v45 = vld [vmem:[%s3263_s3 + $0x48] sm:$0xff]  ;;  %v1541_v5 = vld [vmem:[%s3263_s3 + $0x40] sm:$0xff]  ;;  %v1540_v46 = vld [vmem:[%s3263_s3 + $0x38] sm:$0xff] }
 0x793   : > { %v1375_v52 = vrot.slane %v1374_v47, 4  ;;  %v1384_v53 = vrot.slane %v1383_v60, 4  ;;  %1621 = vmatpush1.msra.mxu1 %v1553_v21  ;;  %v1571_v37 = vld [vmem:[%s3263_s3 + $0x130] sm:$0xff]  ;;  %v1570_v39 = vld [vmem:[%s3263_s3 + $0x128] sm:$0xff]  ;;  %v1569_v26 = vld [vmem:[%s3263_s3 + $0x120] sm:$0xff] }
 0x794   : > { %1622 = vmatprep.subr.mxu1 %v1552_v2  ;;  %v1568_v30 = vld [vmem:[%s3263_s3 + $0x118] sm:$0xff]  ;;  %v1567_v21 = vld [vmem:[%s3263_s3 + $0x110] sm:$0xff]  ;;  %v1566_v2 = vld [vmem:[%s3263_s3 + $0x108] sm:$0xff] }
 0x795   : > { %v1376_v8 = vadd.f32 %v1375_v52, %v1374_v47  ;;  %v1385_v32 = vadd.f32 %v1384_v53, %v1383_v60  ;;  %1623 = vmatpush1.msra.mxu1 %v1551_v6  ;;  %v1539_v47 = vld [vmem:[%s3263_s3 + $0x30] sm:$0xff]  ;;  %v1538_v60 = vld [vmem:[%s3263_s3 + $0x28] sm:$0xff]  ;;  %v1537_v52 = vld [vmem:[%s3263_s3 + $0x20] sm:$0xff] }
 0x796   : > { %1624 = vmatprep.subr.mxu1 %v1550_v7  ;;  %v1536_v53 = vld [vmem:[%s3263_s3 + $0x18] sm:$0xff]  ;;  %v1565_v6 = vld [vmem:[%s3263_s3 + $0x100] sm:$0xff] }
 0x797   : > { %v1377_v55 = vrot.slane %v1376_v8, 2  ;;  %v1386_v23 = vrot.slane %v1385_v32, 2  ;;  %1625 = vmatpush1.msra.mxu1 %v1549_v3 }
 0x798   : > { %1626 = vmatprep.subr.mxu1 %v1548_v29 }
 0x799   : > { %v1378_v56 = vadd.f32 %v1377_v55, %v1376_v8  ;;  %v1387_v9 = vadd.f32 %v1386_v23, %v1385_v32  ;;  %1627 = vmatpush1.msra.mxu1 %v1547_v44  ;;  %v1535_v8 = vld [vmem:[%s3263_s3 + $0x10] sm:$0xff]  ;;  %v1534_v32 = vld [vmem:[%s3263_s3 + $0x8] sm:$0xff]  ;;  %v1533_v55 = vld [vmem:[%s3263_s3] sm:$0xff] }
 0x79a   : > { %1628 = vmatprep.subr.mxu1 %v1546_v22  ;;  %v1596_v23 = vld [vmem:[%s3263_s3 + $0x1f8] sm:$0xff] }
 0x79b   : > { %v1379_v57 = vrot.slane %v1378_v56, 1  ;;  %v1388_v10 = vrot.slane %v1387_v9, 1  ;;  %1629 = vmatpush1.msra.mxu1 %v1545_v38 }
 0x79c   : > { %1630 = vmatprep.subr.mxu1 %v1544_v16 }
 0x79d   : > { %v1380_v58 = vadd.f32 %v1379_v57, %v1378_v56  ;;  %v1389_v11 = vadd.f32 %v1388_v10, %v1387_v9  ;;  %1631 = vmatpush1.msra.mxu1 %v1543_v49  ;;  %v1595_v56 = vld [vmem:[%s3263_s3 + $0x1f0] sm:$0xff]  ;;  %v1594_v9 = vld [vmem:[%s3263_s3 + $0x1e8] sm:$0xff]  ;;  %v1593_v57 = vld [vmem:[%s3263_s3 + $0x1e0] sm:$0xff] }
 0x79e   : > { %1632 = vmatprep.subr.mxu1 %v1542_v45  ;;  %v1592_v10 = vld [vmem:[%s3263_s3 + $0x1d8] sm:$0xff] }
 0x79f   : > { %v2112_v31 = vpack.i.bf16 %v1389_v11, %v1380_v58  ;;  %1633 = vmatpush1.msra.mxu1 %v1541_v5  ;;  %v1591_v58 = vld [vmem:[%s3263_s3 + $0x1d0] sm:$0xff]  ;;  %v1590_v11 = vld [vmem:[%s3263_s3 + $0x1c8] sm:$0xff] }
 0x7a0   : > { %1634 = vmatprep.subr.mxu1 %v1540_v46 }
 0x7a1   : > { %2113 = vrot.lane.b32.xlu0 %v2112_v31, %s2171_s21  ;;  %1635 = vmatpush1.msra.mxu1 %v1539_v47  ;;  %v1589_v31 = vld [vmem:[%s3263_s3 + $0x1c0] sm:$0xff] }
 0x7a2   : > { %1636 = vmatprep.subr.mxu1 %v1538_v60 }
 0x7a3   : > { %1637 = vmatpush1.msra.mxu1 %v1537_v52 }
 0x7a4   : > { %1638 = vmatprep.subr.mxu1 %v1536_v53 }
 0x7a5   : > { %1485 = vrot.lane.b32.xlu0 %v1483_v34, %s2170_s30  ;;  %1639 = vmatpush1.msra.mxu1 %v1535_v8  ;;  %v1583_v34 = vld [vmem:[%s3263_s3 + $0x190] sm:$0xff] }
 0x7a6   : > { %1640 = vmatprep.subr.mxu1 %v1534_v32 }
 0x7a7   : > { %1641 = vmatpush1.msra.mxu1 %v1533_v55 }
 0x7a8   : > { %1642 = vmatprep.subr.mxu1 %v1596_v23 }
 0x7a9   : > { %1643 = vmatpush2.msra.mxu1 %v1595_v56 }
 0x7aa   : > { %1644 = vmatprep.subr.mxu1 %v1594_v9 }
 0x7ab   : > { %1645 = vmatpush2.msra.mxu1 %v1593_v57 }
 0x7ac   : > { %1646 = vmatprep.subr.mxu1 %v1592_v10 }
 0x7ad   : > { %1647 = vmatpush2.msra.mxu1 %v1591_v58 }
 0x7ae   : > { %1648 = vmatprep.subr.mxu1 %v1590_v11 }
 0x7af   : > { %1649 = vmatpush2.msra.mxu1 %v1589_v31 }
 0x7c7   : > { %v3018_v12 = vpop.f32.mrf.mxu0 }
 0x7c8   : > { %v1178_v31 = vadd.f32 1e-05, %v3018_v12 }
 0x7c9   : > { %v2002_v54 = vpop.f32.mrf.mxu0 }
 0x7ca   : > { %v1588_v54 = vld [vmem:[%s3263_s3 + $0x1b8] sm:$0xff] }
 0x7cb   : > { %1650 = vmatprep.subr.mxu1 %v1588_v54 }
 0x813   : > { %v2114_v14 = vpop.permute.xlu0 %2113 }
 0x814   : > { %v2116_v15 = vunpack.i.h.bf16 %v2114_v14  ;;  %v2115_v17 = vunpack.i.l.bf16 %v2114_v14  ;;  %v1587_v14 = vld [vmem:[%s3263_s3 + $0x1b0] sm:$0xff] }
 0x815   : > { %1651 = vmatpush2.msra.mxu1 %v1587_v14 }
 0x816   : > { %v1396_v20 = vsel %vm344_vm2, %v2115_v17, %v2116_v15  ;;  %v1586_v15 = vld [vmem:[%s3263_s3 + $0x1a8] sm:$0xff]  ;;  %v1585_v17 = vld [vmem:[%s3263_s3 + $0x1a0] sm:$0xff] }
 0x817   : > { %2071 = vmatmul.mubr.f32.vlgmr.msra.gmra.mxu0 %v1396_v20  ;;  %v1584_v20 = vld [vmem:[%s3263_s3 + $0x198] sm:$0xff]  ;;  %1652 = vmatprep.subr.mxu1 %v1586_v15  ;;  %v1486_v33 = vpop.permute.xlu0 %1485 }
 0x818   : > { %1653 = vmatpush2.msra.mxu1 %v1585_v17  ;;  %v1188_v17 = vld [vmem:[%s3261_s1 + $0x16] ss:$0 sm:$0xff] }
 0x819   : > { %1654 = vmatprep.subr.mxu1 %v1584_v20 }
 0x81a   : > { %1655 = vmatpush2.msra.mxu1 %v1583_v34 }
 0x8d7   : > { %v1464_v59 = vpop.f32.mrf.mxu0 }
 0x8d8   : > { %v1465_v61 = vadd.f32 1e-05, %v1464_v59  ;;  %v1582_v59 = vld [vmem:[%s3263_s3 + $0x188] sm:$0xff] }
 0x8d9   : > { %v2072_v62 = vpop.f32.mrf.mxu0  ;;  %1656 = vmatprep.subr.mxu1 %v1582_v59 }
 0x8da   : > { %2137 = vrsqrt.f32 %v1465_v61  ;;  %v1581_v61 = vld [vmem:[%s3263_s3 + $0x180] sm:$0xff]  ;;  %v1580_v62 = vld [vmem:[%s3263_s3 + $0x178] sm:$0xff] }
 0x8db   : > { %1657 = vmatpush2.msra.mxu1 %v1581_v61  ;;  %2139 = vrsqrt.f32 %v1178_v31  ;;  %v1191_v61 = vld [vmem:[%s3261_s1 + $0x17] ss:$0 sm:$0xff] }
 0x8dc   : > { %1658 = vmatprep.subr.mxu1 %v1580_v62 }
 0x8e7   : > { %v2138_v63 = vpop.eup %2137 }
 0x8e8   : > { %v1472_v40 = vrot.slane %v2138_v63, %v2612_v51  ;;  %v1579_v63 = vld [vmem:[%s3263_s3 + $0x170] sm:$0xff]  ;;  %v2140_v54 = vpop.eup %2139 }
 0x8e9   : > { %1659 = vmatpush2.msra.mxu1 %v1579_v63  ;;  %v1185_v14 = vrot.slane %v2140_v54, %v2612_v51 }
 0x8ea   : > { %1474 = vrot.lane.b32.xlu1 %v1472_v40, %s2170_s30  ;;  %v1578_v40 = vld [vmem:[%s3263_s3 + $0x168] sm:$0xff] }
 0x8eb   : > { %1660 = vmatprep.subr.mxu1 %v1578_v40  ;;  %v1186_v15 = vmul.f32 %v1185_v14, %v2946_v18  ;;  %v1187_v34 = vmul.f32 %v1185_v14, %v2949_v19 }
 0x8ec   : > { %1661 = vmatpush2.msra.mxu1 %v1577_v25 }
 0x8ed   : > { %1662 = vmatprep.subr.mxu1 %v1576_v28  ;;  %v1189_v20 = vmul.f32 %v1188_v17, %v1186_v15 }
 0x8ee   : > { %1496 = vrot.lane.b32.xlu1 %v1494_v36, %s2170_s30  ;;  %v1573_v36 = vld [vmem:[%s3263_s3 + $0x140] sm:$0xff]  ;;  %1663 = vmatpush2.msra.mxu1 %v1575_v0  ;;  %v1190_v0 = vmul.f32 %v1188_v17, %v1187_v34 }
 0x8ef   : > { %1664 = vmatprep.subr.mxu1 %v1574_v1  ;;  %v1192_v28 = vadd.f32 %v1191_v61, %v1189_v20 }
 0x8f0   : > { %1665 = vmatpush2.msra.mxu1 %v1573_v36  ;;  %v1193_v19 = vadd.f32 %v1191_v61, %v1190_v0  ;;  %v1757_v36 = vld [vmem:[%s3261_s1 + $0x25] ss:$8 sm:$0x3] }
 0x8f1   : > { %1666 = vmatprep.subr.mxu1 %v1572_v48  ;;  %v1603_v48 = vrot.slane %v1757_v36, %v2612_v51 }
 0x8f2   : > { %1667 = vmatpush2.msra.mxu1 %v1571_v37  ;;  %v1607_v37 = vrot.slane %v1757_v36, %v890_v13 }
 0x8f3   : > { %1668 = vmatprep.subr.mxu1 %v1570_v39 }
 0x8f4   : > { %1669 = vmatpush2.msra.mxu1 %v1569_v26 }
 0x8f5   : > { %1670 = vmatprep.subr.mxu1 %v1568_v30 }
 0x8f6   : > { %1671 = vmatpush2.msra.mxu1 %v1567_v21 }
 0x8f7   : > { %1672 = vmatprep.subr.mxu1 %v1566_v2 }
 0x8f8   : > { %1673 = vmatpush2.msra.mxu1 %v1565_v6 }
 0x95c   : > { %v1475_v42 = vpop.permute.xlu1 %1474 }
 0x95d   : > { %v1477_v7 = vmul.f32 %v1475_v42, %v2980_v41  ;;  %v1478_v3 = vmul.f32 %v1475_v42, %v2983_v35  ;;  %v1479_v29 = vmul.f32 %v1475_v42, %v2986_v43  ;;  %v1480_v44 = vmul.f32 %v1475_v42, %v2989_v24 }
 0x95e   : > { %v1481_v22 = vmul.f32 %v1475_v42, %v2992_v27  ;;  %v1482_v38 = vmul.f32 %v1475_v42, %v2995_v4 }
 0x95f   : > { %v1488_v16 = vmul.f32 %v1486_v33, %v1477_v7  ;;  %v1489_v49 = vmul.f32 %v1486_v33, %v1478_v3  ;;  %v1490_v45 = vmul.f32 %v1486_v33, %v1479_v29  ;;  %v1491_v5 = vmul.f32 %v1486_v33, %v1480_v44 }
 0x960   : > { %v1492_v46 = vmul.f32 %v1486_v33, %v1481_v22  ;;  %v1493_v47 = vmul.f32 %v1486_v33, %v1482_v38  ;;  %v1497_v41 = vpop.permute.xlu1 %1496 }
 0x961   : > { %v1501_v60 = vadd.f32 %v1497_v41, %v1490_v45  ;;  %v1502_v35 = vadd.f32 %v1497_v41, %v1491_v5  ;;  %v1499_v52 = vadd.f32 %v1497_v41, %v1488_v16  ;;  %v1500_v43 = vadd.f32 %v1497_v41, %v1489_v49 }
 0x962   : > { %v1503_v53 = vadd.f32 %v1497_v41, %v1492_v46  ;;  %v1504_v24 = vadd.f32 %v1497_v41, %v1493_v47 }
 0x963   : > { %v1512_v8 = vrot.slane %v1501_v60, 1  ;;  %v1515_v32 = vrot.slane %v1502_v35, 1  ;;  %v1511_v27 = vrot.slane %v1499_v52, 1  ;;  %v1514_v55 = vrot.slane %v1500_v43, 1 }
 0x964   : > { %v1517_v4 = vrot.slane %v1503_v53, 1  ;;  %v1519_v23 = vrot.slane %v1504_v24, 1 }
 0x965   : > { %v1513_v56 = vsel %vm433_vm1, %v1511_v27, %v1512_v8  ;;  %v1516_v9 = vsel %vm433_vm1, %v1514_v55, %v1515_v32 }
 0x966   : > { %v1518_v57 = vsel %vm433_vm1, %v1512_v8, %v1517_v4  ;;  %v1520_v10 = vsel %vm433_vm1, %v1515_v32, %v1519_v23  ;;  %v2117_v58 = vpack.i.bf16 %v1516_v9, %v1513_v56 }
 0x967   : > { %v2122_v11 = vpack.i.bf16 %v1520_v10, %v1518_v57 }
 0x968   : > { %2118 = vrot.lane.b32.xlu0 %v2117_v58, %s2171_s21 }
 0x969   : > { %2123 = vrot.lane.b32.xlu1 %v2122_v11, %s2171_s21 }
 0x9da   : > { %v2119_v59 = vpop.permute.xlu0 %2118 }
 0x9db   : > { %v2124_v12 = vpop.permute.xlu1 %2123  ;;  %v2121_v62 = vunpack.i.h.bf16 %v2119_v59  ;;  %v2120_v63 = vunpack.i.l.bf16 %v2119_v59 }
 0x9dc   : > { %v2126_v40 = vunpack.i.h.bf16 %v2124_v12  ;;  %v2125_v25 = vunpack.i.l.bf16 %v2124_v12 }
 0x9dd   : > { %v1529_v18 = vsel %vm344_vm2, %v2120_v63, %v2121_v62 }
 0x9de   : > { %1674 = vmatprep.mubr.f32.mxu1 %v1529_v18  ;;  %v1530_v1 = vsel %vm344_vm2, %v2125_v25, %v2126_v40 }
 0x9df   : > { %1675 = vmatmul.mubr.f32.vlgmr.msra.gmra.mxu1 %v1192_v28 }
 0x9e0   : > { %1680 = vmatprep.mubr.f32.mxu1 %v1530_v1 }
 0x9e3   : > { %1681 = vmatmul.mubr.f32.gmra.mxu1 %v1193_v19 }
 0xa9f   : > { %v1676_v39 = vpop.f32.mrf.mxu1 }
 0xaa0   : > { %v1677_v26 = vadd.f32 %v1676_v39, %v1603_v48 }
 0xaa1   : > { %v1678_v30 = vpop.f32.mrf.mxu1 }
 0xaa2   : > { %1687 = vst [vmem:[%s224_s12] sm:$0xff] %v1677_v26  ;;  %v1679_v42 = vadd.f32 %v1678_v30, %v1607_v37 }
 0xaa3   : > { %v1682_v33 = vpop.f32.mrf.mxu1 }
 0xaa4   : > { %1688 = vst [vmem:[%s224_s12 + $0x8] sm:$0xff] %v1679_v42  ;;  %v1683_v21 = vadd.f32 %v1682_v33, %v1603_v48 }
 0xaa5   : > { %v1684_v2 = vpop.f32.mrf.mxu1 }
 0xaa6   : > { %1689 = vst [vmem:[%s224_s12 + $0x10] sm:$0xff] %v1683_v21  ;;  %v1685_v6 = vadd.f32 %v1684_v2, %v1607_v37 }
 0xaa8   : > { %1690 = vst [vmem:[%s224_s12 + $0x18] sm:$0xff] %v1685_v6 }
 0xaa9 PF: > { %s15_s18 = sadd.s32 1, %s2167_s18  }
 0xaaa   : > { %p12_p4 = scmp.ge.s32.totalorder %s15_s18, 4  }
 0xaac   :  { %14 = sbr.rel (!%p12_p4) target bundleno = 1 (0x1), region = 72 }

</bundles_post_ra>
